<compile_context>
chip_gen: v6e
topology: v6e:2x2x1
jax: 0.10.0
libtpu: 0.0.40
codegen_flags: <defaults>
</compile_context>

<pallas_src>
import math
import functools

import jax
import jax.numpy as jnp
from jax import lax
from jax.experimental import pallas as pl
from jax.experimental.pallas import tpu as pltpu


def _mha_kernel(x_ref,
                wq_ref, bq_ref, wk_ref, bk_ref, wv_ref, bv_ref, wo_ref, bo_ref,
                o_ref,
                k_scr, v_scr, corr_scr,
                *, num_heads, head_dim, eps, kv_len, q_tile):
    """One (batch element, query tile) grid step.

    x_ref          : (S, H)        f32  -- resident across all query tiles of b
    wq/wk/wv_ref   : (NH, H, hd)   bf16 -- per-head slabs, leading-axis indexed
    bq/bk/bv_ref   : (NH, 1, hd)   f32
    wo_ref         : (NH, hd, H)   bf16
    bo_ref         : (1, H)        f32
    o_ref          : (TQ, H)       f32
    k_scr, v_scr   : (NH, S, hd)   bf16 VMEM, filled once per batch element
    corr_scr       : (1, H)        f32  -- rank-1 eps-renorm correction
    """
    qi = pl.program_id(1)
    hidden = num_heads * head_dim
    inv_scale = 1.0 / (math.sqrt(head_dim) + eps)
    # reference: p = (softmax + eps) / (1 + S*eps)
    renorm = 1.0 / (1.0 + kv_len * eps)

    # ---- K/V projections: once per batch element (qi == 0), cached in
    # (head, seq, head_dim) bf16 scratch.  Also precompute the exact f32 eps
    # correction  eps*renorm * colsum(V) @ Wo  (a single (1, H) vector).
    @pl.when(qi == 0)
    def _():
        xkv = x_ref[...].astype(jnp.bfloat16)                          # (S, H)
        corr = jnp.zeros((1, hidden), jnp.float32)
        for h in range(num_heads):
            kh = jnp.dot(xkv, wk_ref[h],
                         preferred_element_type=jnp.float32) + bk_ref[h]
            vh = jnp.dot(xkv, wv_ref[h],
                         preferred_element_type=jnp.float32) + bv_ref[h]
            k_scr[h] = kh.astype(jnp.bfloat16)
            v_scr[h] = vh.astype(jnp.bfloat16)
            vsum = jnp.sum(vh, axis=0, keepdims=True)                  # (1, hd)
            corr = corr + jnp.dot(vsum.astype(jnp.bfloat16), wo_ref[h],
                                  preferred_element_type=jnp.float32)
        corr_scr[...] = corr * (eps * renorm)

    # ---- Query tile, sliced from the resident x block (x read from HBM once
    # per batch element; no duplicate xq stream).
    q_start = pl.multiple_of(qi * q_tile, q_tile)
    xq = x_ref[pl.ds(q_start, q_tile), :].astype(jnp.bfloat16)         # (TQ, H)

    # f32 output accumulator: out = sum_h ctx_h @ Wo_h.
    o_ref[...] = jnp.zeros_like(o_ref)

    for h in range(num_heads):
        # Q projection for this head; fold 1/(sqrt(hd)+eps) into Q so the
        # (TQ, S) score tile never sees an elementwise divide.
        qh = jnp.dot(xq, wq_ref[h],
                     preferred_element_type=jnp.float32) + bq_ref[h]
        qh = (qh * inv_scale).astype(jnp.bfloat16)                     # (TQ, hd)
        kh = k_scr[h]                                                  # (S, hd)
        vh = v_scr[h]                                                  # (S, hd)

        # scores = q_scaled @ k^T  -- NT dot_general (no XLU transpose).
        s = lax.dot_general(qh, kh, (((1,), (1,)), ((), ())),
                            preferred_element_type=jnp.float32)        # (TQ, S)
        s = jnp.clip(s, -100.0, 100.0)

        # f32 softmax; reciprocal on the EUP slot; renorm folded into the scale.
        m = jnp.max(s, axis=-1, keepdims=True)
        e = jnp.exp(s - m)
        inv_sum = pl.reciprocal(jnp.sum(e, axis=-1, keepdims=True), approx=True)
        p = (e * (inv_sum * renorm)).astype(jnp.bfloat16)              # (TQ, S)

        # TODO(synk): training-mode dropout on p would go here (eval: identity).

        ctx = jnp.dot(p, vh, preferred_element_type=jnp.float32)       # (TQ, hd)
        o_ref[...] += jnp.dot(ctx.astype(jnp.bfloat16), wo_ref[h],
                              preferred_element_type=jnp.float32)

    out = o_ref[...] + bo_ref[...] + corr_scr[...]
    out = jnp.where(jnp.isnan(out), jnp.zeros_like(out), out)
    o_ref[...] = out.astype(o_ref.dtype)


def multi_head_attention(x, params, *, num_heads):
    """x: [B, S, H] float32.  params: wq,bq,wk,bk,wv,bv,wo,bo with weights
    already stored as [H_in, H_out]."""
    B, S, H = x.shape
    head_dim = H // num_heads
    assert head_dim * num_heads == H
    eps = 1e-6

    # Query-tile size bounds the (TQ, S) score temporaries.
    if S <= 256:
        TQ = S
    else:
        # TODO(synk): pad/mask ragged query tiles when S % 256 != 0.
        assert S % 256 == 0, "S must be a multiple of 256 when S > 256"
        TQ = 256
    QT = S // TQ

    # Pre-split weights per head so the kernel only does leading-axis indexing
    # (no in-kernel lane slicing / relayout).  bf16 MXU operands, f32 biases.
    def split_in(w):    # [H, H] (in, out) -> (NH, H, hd)
        return jnp.transpose(w.reshape(H, num_heads, head_dim),
                             (1, 0, 2)).astype(jnp.bfloat16)

    def split_bias(b):  # [H] -> (NH, 1, hd)
        return b.reshape(num_heads, 1, head_dim).astype(jnp.float32)

    wq, bq = split_in(params["wq"]), split_bias(params["bq"])
    wk, bk = split_in(params["wk"]), split_bias(params["bk"])
    wv, bv = split_in(params["wv"]), split_bias(params["bv"])
    wo = params["wo"].reshape(num_heads, head_dim, H).astype(jnp.bfloat16)
    bo = params["bo"].reshape(1, H).astype(jnp.float32)

    kernel = functools.partial(_mha_kernel, num_heads=num_heads,
                               head_dim=head_dim, eps=eps, kv_len=S, q_tile=TQ)

    # Constant-index blocks (weights/biases) are fetched once -> single buffer.
    def const_spec(shape):
        return pl.BlockSpec(shape, lambda b, qi: (0,) * len(shape),
                            pipeline_mode=pl.Buffered(1))

    x_spec = pl.BlockSpec((None, S, H), lambda b, qi: (b, 0, 0))
    o_spec = pl.BlockSpec((None, TQ, H), lambda b, qi: (b, qi, 0))

    in_specs = [
        x_spec,
        const_spec((num_heads, H, head_dim)), const_spec((num_heads, 1, head_dim)),  # Q
        const_spec((num_heads, H, head_dim)), const_spec((num_heads, 1, head_dim)),  # K
        const_spec((num_heads, H, head_dim)), const_spec((num_heads, 1, head_dim)),  # V
        const_spec((num_heads, head_dim, H)), const_spec((1, H)),                    # O
    ]

    # Scoped-VMEM budget: raise above the defaults (16/32 MiB) but stay below
    # the smallest physical VMEM (v7x: 64 MiB per TensorCore).
    try:
        phys = pltpu.get_tpu_info().vmem_capacity_bytes
        vmem_limit = min(int(phys) * 7 // 8, 100 * 1024 * 1024)
    except Exception:
        vmem_limit = 56 * 1024 * 1024

    flops = 8 * B * S * H * H + 4 * B * S * S * H
    transcendentals = B * num_heads * S * S
    bytes_accessed = (B * S * H * 4        # x read once (f32)
                      + 4 * H * H * 2      # weights (bf16)
                      + 4 * H * 4          # biases (f32)
                      + B * S * H * 4)     # output (f32)

    return pl.pallas_call(
        kernel,
        out_shape=jax.ShapeDtypeStruct((B, S, H), jnp.float32),
        grid_spec=pltpu.PrefetchScalarGridSpec(
            num_scalar_prefetch=0,
            grid=(B, QT),
            in_specs=in_specs,
            out_specs=o_spec,
            scratch_shapes=[
                pltpu.VMEM((num_heads, S, head_dim), jnp.bfloat16),   # cached K
                pltpu.VMEM((num_heads, S, head_dim), jnp.bfloat16),   # cached V
                pltpu.VMEM((1, H), jnp.float32),                      # eps correction
            ]),
        compiler_params=pltpu.CompilerParams(
            dimension_semantics=("parallel", "arbitrary"),
            vmem_limit_bytes=vmem_limit),
        cost_estimate=pl.CostEstimate(flops=flops,
                                      transcendentals=transcendentals,
                                      bytes_accessed=bytes_accessed),
    )(x, wq, bq, wk, bk, wv, bv, wo, bo)


def _init_params(key, hidden_dim):
    """Deterministic init mimicking nn.Linear defaults (uniform +-1/sqrt(fan_in)).
    Weights stored as [H_in, H_out] (already transposed for x @ W)."""
    bound = 1.0 / math.sqrt(hidden_dim)
    keys = jax.random.split(key, 8)

    def w(k):
        return jax.random.uniform(k, (hidden_dim, hidden_dim), jnp.float32,
                                  minval=-bound, maxval=bound)

    def b(k):
        return jax.random.uniform(k, (hidden_dim,), jnp.float32,
                                  minval=-bound, maxval=bound)

    return {"wq": w(keys[0]), "bq": b(keys[1]),
            "wk": w(keys[2]), "bk": b(keys[3]),
            "wv": w(keys[4]), "bv": b(keys[5]),
            "wo": w(keys[6]), "bo": b(keys[7])}


def _reference(x, p, num_heads):
    """Pure-JAX f32 reference of the PyTorch forward (eval mode, mask=None)."""
    B, S, H = x.shape
    hd = H // num_heads
    eps = 1e-6
    q = x @ p["wq"] + p["bq"]
    k = x @ p["wk"] + p["bk"]
    v = x @ p["wv"] + p["bv"]

    def split(t):
        return t.reshape(B, S, num_heads, hd).transpose(0, 2, 1, 3)

    q, k, v = split(q), split(k), split(v)
    scores = jnp.einsum("bhqd,bhkd->bhqk", q, k) / (math.sqrt(hd) + eps)
    scores = jnp.clip(scores, -100.0, 100.0)
    attn = jax.nn.softmax(scores, axis=-1)
    attn = attn + eps
    attn = attn / jnp.sum(attn, axis=-1, keepdims=True)
    ctx = jnp.einsum("bhqk,bhkd->bhqd", attn, v)
    ctx = ctx.transpose(0, 2, 1, 3).reshape(B, S, H)
    out = ctx @ p["wo"] + p["bo"]
    return jnp.where(jnp.isnan(out), jnp.zeros_like(out), out)


if __name__ == "__main__":
    B, S, H, NH = 2, 8, 32, 4

    key = jax.random.PRNGKey(0)
    kx, kp = jax.random.split(key)
    x = jax.random.normal(kx, (B, S, H), jnp.float32)
    params = _init_params(kp, H)

    out = multi_head_attention(x, params, num_heads=NH)
    out = jax.block_until_ready(out)

    ref = _reference(x, params, NH)
    assert out.shape == (B, S, H)
    # Kernel feeds bf16 operands to the MXU (f32 accumulation) and uses an
    # approximate EUP reciprocal; reference is full f32, so tolerance is relaxed.
    assert jnp.allclose(out, ref, atol=5e-2, rtol=5e-2), "mismatch vs reference"

    print("KERNEL_OK")
</pallas_src>

<mosaic_0001>
module attributes {stable_mosaic.version = 11 : i64} {
  func.func @_mha_kernel(%arg0: i32, %arg1: i32, %arg2: memref<1x8x32xf32, #tpu.memory_space<vmem>>, %arg3: memref<4x32x8xbf16, #tpu.memory_space<vmem>>, %arg4: memref<4x1x8xf32, #tpu.memory_space<vmem>>, %arg5: memref<4x32x8xbf16, #tpu.memory_space<vmem>>, %arg6: memref<4x1x8xf32, #tpu.memory_space<vmem>>, %arg7: memref<4x32x8xbf16, #tpu.memory_space<vmem>>, %arg8: memref<4x1x8xf32, #tpu.memory_space<vmem>>, %arg9: memref<4x8x32xbf16, #tpu.memory_space<vmem>>, %arg10: memref<1x32xf32, #tpu.memory_space<vmem>>, %arg11: memref<1x8x32xf32, #tpu.memory_space<vmem>>, %arg12: memref<4x8x8xbf16, #tpu.memory_space<vmem>>, %arg13: memref<4x8x8xbf16, #tpu.memory_space<vmem>>, %arg14: memref<1x32xf32, #tpu.memory_space<vmem>>) attributes {dimension_semantics = [#tpu.dimension_semantics<parallel>, #tpu.dimension_semantics<arbitrary>], iteration_bounds = array<i64: 2, 1>, scalar_prefetch = 0 : i64, scratch_operands = 3 : i64, tpu.core_type = #tpu.core_type<tc>, window_params = [{transform_indices = @transform_0, window_bounds = array<i64: 1, 8, 32>}, {pipeline_mode = #tpu.pipeline_mode<synchronous>, transform_indices = @transform_1, window_bounds = array<i64: 4, 32, 8>}, {pipeline_mode = #tpu.pipeline_mode<synchronous>, transform_indices = @transform_2, window_bounds = array<i64: 4, 1, 8>}, {pipeline_mode = #tpu.pipeline_mode<synchronous>, transform_indices = @transform_3, window_bounds = array<i64: 4, 32, 8>}, {pipeline_mode = #tpu.pipeline_mode<synchronous>, transform_indices = @transform_4, window_bounds = array<i64: 4, 1, 8>}, {pipeline_mode = #tpu.pipeline_mode<synchronous>, transform_indices = @transform_5, window_bounds = array<i64: 4, 32, 8>}, {pipeline_mode = #tpu.pipeline_mode<synchronous>, transform_indices = @transform_6, window_bounds = array<i64: 4, 1, 8>}, {pipeline_mode = #tpu.pipeline_mode<synchronous>, transform_indices = @transform_7, window_bounds = array<i64: 4, 8, 32>}, {pipeline_mode = #tpu.pipeline_mode<synchronous>, transform_indices = @transform_8, window_bounds = array<i64: 1, 32>}, {transform_indices = @transform_9, window_bounds = array<i64: 1, 8, 32>}]} {
    %c0_i32 = arith.constant 0 : i32
    %0 = arith.cmpi eq, %arg1, %c0_i32 : i32
    %1 = arith.extui %0 : i1 to i32
    %c0_i32_0 = arith.constant 0 : i32
    %2 = arith.cmpi ne, %1, %c0_i32_0 : i32
    scf.if %2 {
      %c0_137 = arith.constant 0 : index
      %c0_138 = arith.constant 0 : index
      %c0_139 = arith.constant 0 : index
      %199 = vector.load %arg2[%c0_137, %c0_138, %c0_139] : memref<1x8x32xf32, #tpu.memory_space<vmem>>, vector<1x8x32xf32>
      %200 = vector.shape_cast %199 : vector<1x8x32xf32> to vector<8x32xf32>
      %201 = arith.truncf %200 : vector<8x32xf32> to vector<8x32xbf16>
      %cst_140 = arith.constant 0.000000e+00 : f32
      %202 = vector.broadcast %cst_140 : f32 to vector<1x32xf32>
      %c0_141 = arith.constant 0 : index
      %c0_142 = arith.constant 0 : index
      %c0_143 = arith.constant 0 : index
      %203 = vector.load %arg5[%c0_141, %c0_142, %c0_143] : memref<4x32x8xbf16, #tpu.memory_space<vmem>>, vector<1x32x8xbf16>
      %204 = vector.shape_cast %203 : vector<1x32x8xbf16> to vector<32x8xbf16>
      %cst_144 = arith.constant dense<0.000000e+00> : vector<8x8xf32>
      %205 = tpu.matmul %201, %204, %cst_144 {dimension_numbers = #tpu.dot_dimension_numbers<[1], [0], [0], [1], [0, 0, 1, 1], [], []>} : vector<8x32xbf16>, vector<32x8xbf16>, vector<8x8xf32> -> vector<8x8xf32>
      %c0_145 = arith.constant 0 : index
      %c0_146 = arith.constant 0 : index
      %c0_147 = arith.constant 0 : index
      %206 = vector.load %arg6[%c0_145, %c0_146, %c0_147] : memref<4x1x8xf32, #tpu.memory_space<vmem>>, vector<1x1x8xf32>
      %207 = vector.shape_cast %206 : vector<1x1x8xf32> to vector<1x8xf32>
      %208 = vector.broadcast %207 : vector<1x8xf32> to vector<8x8xf32>
      %209 = arith.addf %205, %208 : vector<8x8xf32>
      %c0_148 = arith.constant 0 : index
      %c0_149 = arith.constant 0 : index
      %c0_150 = arith.constant 0 : index
      %210 = vector.load %arg7[%c0_148, %c0_149, %c0_150] : memref<4x32x8xbf16, #tpu.memory_space<vmem>>, vector<1x32x8xbf16>
      %211 = vector.shape_cast %210 : vector<1x32x8xbf16> to vector<32x8xbf16>
      %cst_151 = arith.constant dense<0.000000e+00> : vector<8x8xf32>
      %212 = tpu.matmul %201, %211, %cst_151 {dimension_numbers = #tpu.dot_dimension_numbers<[1], [0], [0], [1], [0, 0, 1, 1], [], []>} : vector<8x32xbf16>, vector<32x8xbf16>, vector<8x8xf32> -> vector<8x8xf32>
      %c0_152 = arith.constant 0 : index
      %c0_153 = arith.constant 0 : index
      %c0_154 = arith.constant 0 : index
      %213 = vector.load %arg8[%c0_152, %c0_153, %c0_154] : memref<4x1x8xf32, #tpu.memory_space<vmem>>, vector<1x1x8xf32>
      %214 = vector.shape_cast %213 : vector<1x1x8xf32> to vector<1x8xf32>
      %215 = vector.broadcast %214 : vector<1x8xf32> to vector<8x8xf32>
      %216 = arith.addf %212, %215 : vector<8x8xf32>
      %217 = arith.truncf %209 : vector<8x8xf32> to vector<8x8xbf16>
      %c0_155 = arith.constant 0 : index
      %c0_156 = arith.constant 0 : index
      %c0_157 = arith.constant 0 : index
      %218 = vector.load %arg12[%c0_155, %c0_156, %c0_157] : memref<4x8x8xbf16, #tpu.memory_space<vmem>>, vector<1x8x8xbf16>
      %219 = vector.shape_cast %218 : vector<1x8x8xbf16> to vector<8x8xbf16>
      %220 = vector.shape_cast %217 : vector<8x8xbf16> to vector<1x8x8xbf16>
      tpu.vector_store %arg12[%c0_155, %c0_156, %c0_157], %220 {strides = array<i32>} : memref<4x8x8xbf16, #tpu.memory_space<vmem>>, vector<1x8x8xbf16>,
      %221 = arith.truncf %216 : vector<8x8xf32> to vector<8x8xbf16>
      %c0_158 = arith.constant 0 : index
      %c0_159 = arith.constant 0 : index
      %c0_160 = arith.constant 0 : index
      %222 = vector.load %arg13[%c0_158, %c0_159, %c0_160] : memref<4x8x8xbf16, #tpu.memory_space<vmem>>, vector<1x8x8xbf16>
      %223 = vector.shape_cast %222 : vector<1x8x8xbf16> to vector<8x8xbf16>
      %224 = vector.shape_cast %221 : vector<8x8xbf16> to vector<1x8x8xbf16>
      tpu.vector_store %arg13[%c0_158, %c0_159, %c0_160], %224 {strides = array<i32>} : memref<4x8x8xbf16, #tpu.memory_space<vmem>>, vector<1x8x8xbf16>,
      %cst_161 = arith.constant dense<0.000000e+00> : vector<8xf32>
      %225 = vector.multi_reduction <add>, %216, %cst_161 [0] : vector<8x8xf32> to vector<8xf32>
      %226 = vector.shape_cast %225 : vector<8xf32> to vector<1x8xf32>
      %227 = arith.truncf %226 : vector<1x8xf32> to vector<1x8xbf16>
      %c0_162 = arith.constant 0 : index
      %c0_163 = arith.constant 0 : index
      %c0_164 = arith.constant 0 : index
      %228 = vector.load %arg9[%c0_162, %c0_163, %c0_164] : memref<4x8x32xbf16, #tpu.memory_space<vmem>>, vector<1x8x32xbf16>
      %229 = vector.shape_cast %228 : vector<1x8x32xbf16> to vector<8x32xbf16>
      %cst_165 = arith.constant dense<0.000000e+00> : vector<1x32xf32>
      %230 = tpu.matmul %227, %229, %cst_165 {dimension_numbers = #tpu.dot_dimension_numbers<[1], [0], [0], [1], [0, 0, 1, 1], [], []>} : vector<1x8xbf16>, vector<8x32xbf16>, vector<1x32xf32> -> vector<1x32xf32>
      %231 = arith.addf %202, %230 : vector<1x32xf32>
      %c1_166 = arith.constant 1 : index
      %c0_167 = arith.constant 0 : index
      %c0_168 = arith.constant 0 : index
      %232 = vector.load %arg5[%c1_166, %c0_167, %c0_168] : memref<4x32x8xbf16, #tpu.memory_space<vmem>>, vector<1x32x8xbf16>
      %233 = vector.shape_cast %232 : vector<1x32x8xbf16> to vector<32x8xbf16>
      %cst_169 = arith.constant dense<0.000000e+00> : vector<8x8xf32>
      %234 = tpu.matmul %201, %233, %cst_169 {dimension_numbers = #tpu.dot_dimension_numbers<[1], [0], [0], [1], [0, 0, 1, 1], [], []>} : vector<8x32xbf16>, vector<32x8xbf16>, vector<8x8xf32> -> vector<8x8xf32>
      %c1_170 = arith.constant 1 : index
      %c0_171 = arith.constant 0 : index
      %c0_172 = arith.constant 0 : index
      %235 = vector.load %arg6[%c1_170, %c0_171, %c0_172] : memref<4x1x8xf32, #tpu.memory_space<vmem>>, vector<1x1x8xf32>
      %236 = vector.shape_cast %235 : vector<1x1x8xf32> to vector<1x8xf32>
      %237 = vector.broadcast %236 : vector<1x8xf32> to vector<8x8xf32>
      %238 = arith.addf %234, %237 : vector<8x8xf32>
      %c1_173 = arith.constant 1 : index
      %c0_174 = arith.constant 0 : index
      %c0_175 = arith.constant 0 : index
      %239 = vector.load %arg7[%c1_173, %c0_174, %c0_175] : memref<4x32x8xbf16, #tpu.memory_space<vmem>>, vector<1x32x8xbf16>
      %240 = vector.shape_cast %239 : vector<1x32x8xbf16> to vector<32x8xbf16>
      %cst_176 = arith.constant dense<0.000000e+00> : vector<8x8xf32>
      %241 = tpu.matmul %201, %240, %cst_176 {dimension_numbers = #tpu.dot_dimension_numbers<[1], [0], [0], [1], [0, 0, 1, 1], [], []>} : vector<8x32xbf16>, vector<32x8xbf16>, vector<8x8xf32> -> vector<8x8xf32>
      %c1_177 = arith.constant 1 : index
      %c0_178 = arith.constant 0 : index
      %c0_179 = arith.constant 0 : index
      %242 = vector.load %arg8[%c1_177, %c0_178, %c0_179] : memref<4x1x8xf32, #tpu.memory_space<vmem>>, vector<1x1x8xf32>
      %243 = vector.shape_cast %242 : vector<1x1x8xf32> to vector<1x8xf32>
      %244 = vector.broadcast %243 : vector<1x8xf32> to vector<8x8xf32>
      %245 = arith.addf %241, %244 : vector<8x8xf32>
      %246 = arith.truncf %238 : vector<8x8xf32> to vector<8x8xbf16>
      %c1_180 = arith.constant 1 : index
      %c0_181 = arith.constant 0 : index
      %c0_182 = arith.constant 0 : index
      %247 = vector.load %arg12[%c1_180, %c0_181, %c0_182] : memref<4x8x8xbf16, #tpu.memory_space<vmem>>, vector<1x8x8xbf16>
      %248 = vector.shape_cast %247 : vector<1x8x8xbf16> to vector<8x8xbf16>
      %249 = vector.shape_cast %246 : vector<8x8xbf16> to vector<1x8x8xbf16>
      tpu.vector_store %arg12[%c1_180, %c0_181, %c0_182], %249 {strides = array<i32>} : memref<4x8x8xbf16, #tpu.memory_space<vmem>>, vector<1x8x8xbf16>,
      %250 = arith.truncf %245 : vector<8x8xf32> to vector<8x8xbf16>
      %c1_183 = arith.constant 1 : index
      %c0_184 = arith.constant 0 : index
      %c0_185 = arith.constant 0 : index
      %251 = vector.load %arg13[%c1_183, %c0_184, %c0_185] : memref<4x8x8xbf16, #tpu.memory_space<vmem>>, vector<1x8x8xbf16>
      %252 = vector.shape_cast %251 : vector<1x8x8xbf16> to vector<8x8xbf16>
      %253 = vector.shape_cast %250 : vector<8x8xbf16> to vector<1x8x8xbf16>
      tpu.vector_store %arg13[%c1_183, %c0_184, %c0_185], %253 {strides = array<i32>} : memref<4x8x8xbf16, #tpu.memory_space<vmem>>, vector<1x8x8xbf16>,
      %cst_186 = arith.constant dense<0.000000e+00> : vector<8xf32>
      %254 = vector.multi_reduction <add>, %245, %cst_186 [0] : vector<8x8xf32> to vector<8xf32>
      %255 = vector.shape_cast %254 : vector<8xf32> to vector<1x8xf32>
      %256 = arith.truncf %255 : vector<1x8xf32> to vector<1x8xbf16>
      %c1_187 = arith.constant 1 : index
      %c0_188 = arith.constant 0 : index
      %c0_189 = arith.constant 0 : index
      %257 = vector.load %arg9[%c1_187, %c0_188, %c0_189] : memref<4x8x32xbf16, #tpu.memory_space<vmem>>, vector<1x8x32xbf16>
      %258 = vector.shape_cast %257 : vector<1x8x32xbf16> to vector<8x32xbf16>
      %cst_190 = arith.constant dense<0.000000e+00> : vector<1x32xf32>
      %259 = tpu.matmul %256, %258, %cst_190 {dimension_numbers = #tpu.dot_dimension_numbers<[1], [0], [0], [1], [0, 0, 1, 1], [], []>} : vector<1x8xbf16>, vector<8x32xbf16>, vector<1x32xf32> -> vector<1x32xf32>
      %260 = arith.addf %231, %259 : vector<1x32xf32>
      %c2_191 = arith.constant 2 : index
      %c0_192 = arith.constant 0 : index
      %c0_193 = arith.constant 0 : index
      %261 = vector.load %arg5[%c2_191, %c0_192, %c0_193] : memref<4x32x8xbf16, #tpu.memory_space<vmem>>, vector<1x32x8xbf16>
      %262 = vector.shape_cast %261 : vector<1x32x8xbf16> to vector<32x8xbf16>
      %cst_194 = arith.constant dense<0.000000e+00> : vector<8x8xf32>
      %263 = tpu.matmul %201, %262, %cst_194 {dimension_numbers = #tpu.dot_dimension_numbers<[1], [0], [0], [1], [0, 0, 1, 1], [], []>} : vector<8x32xbf16>, vector<32x8xbf16>, vector<8x8xf32> -> vector<8x8xf32>
      %c2_195 = arith.constant 2 : index
      %c0_196 = arith.constant 0 : index
      %c0_197 = arith.constant 0 : index
      %264 = vector.load %arg6[%c2_195, %c0_196, %c0_197] : memref<4x1x8xf32, #tpu.memory_space<vmem>>, vector<1x1x8xf32>
      %265 = vector.shape_cast %264 : vector<1x1x8xf32> to vector<1x8xf32>
      %266 = vector.broadcast %265 : vector<1x8xf32> to vector<8x8xf32>
      %267 = arith.addf %263, %266 : vector<8x8xf32>
      %c2_198 = arith.constant 2 : index
      %c0_199 = arith.constant 0 : index
      %c0_200 = arith.constant 0 : index
      %268 = vector.load %arg7[%c2_198, %c0_199, %c0_200] : memref<4x32x8xbf16, #tpu.memory_space<vmem>>, vector<1x32x8xbf16>
      %269 = vector.shape_cast %268 : vector<1x32x8xbf16> to vector<32x8xbf16>
      %cst_201 = arith.constant dense<0.000000e+00> : vector<8x8xf32>
      %270 = tpu.matmul %201, %269, %cst_201 {dimension_numbers = #tpu.dot_dimension_numbers<[1], [0], [0], [1], [0, 0, 1, 1], [], []>} : vector<8x32xbf16>, vector<32x8xbf16>, vector<8x8xf32> -> vector<8x8xf32>
      %c2_202 = arith.constant 2 : index
      %c0_203 = arith.constant 0 : index
      %c0_204 = arith.constant 0 : index
      %271 = vector.load %arg8[%c2_202, %c0_203, %c0_204] : memref<4x1x8xf32, #tpu.memory_space<vmem>>, vector<1x1x8xf32>
      %272 = vector.shape_cast %271 : vector<1x1x8xf32> to vector<1x8xf32>
      %273 = vector.broadcast %272 : vector<1x8xf32> to vector<8x8xf32>
      %274 = arith.addf %270, %273 : vector<8x8xf32>
      %275 = arith.truncf %267 : vector<8x8xf32> to vector<8x8xbf16>
      %c2_205 = arith.constant 2 : index
      %c0_206 = arith.constant 0 : index
      %c0_207 = arith.constant 0 : index
      %276 = vector.load %arg12[%c2_205, %c0_206, %c0_207] : memref<4x8x8xbf16, #tpu.memory_space<vmem>>, vector<1x8x8xbf16>
      %277 = vector.shape_cast %276 : vector<1x8x8xbf16> to vector<8x8xbf16>
      %278 = vector.shape_cast %275 : vector<8x8xbf16> to vector<1x8x8xbf16>
      tpu.vector_store %arg12[%c2_205, %c0_206, %c0_207], %278 {strides = array<i32>} : memref<4x8x8xbf16, #tpu.memory_space<vmem>>, vector<1x8x8xbf16>,
      %279 = arith.truncf %274 : vector<8x8xf32> to vector<8x8xbf16>
      %c2_208 = arith.constant 2 : index
      %c0_209 = arith.constant 0 : index
      %c0_210 = arith.constant 0 : index
      %280 = vector.load %arg13[%c2_208, %c0_209, %c0_210] : memref<4x8x8xbf16, #tpu.memory_space<vmem>>, vector<1x8x8xbf16>
      %281 = vector.shape_cast %280 : vector<1x8x8xbf16> to vector<8x8xbf16>
      %282 = vector.shape_cast %279 : vector<8x8xbf16> to vector<1x8x8xbf16>
      tpu.vector_store %arg13[%c2_208, %c0_209, %c0_210], %282 {strides = array<i32>} : memref<4x8x8xbf16, #tpu.memory_space<vmem>>, vector<1x8x8xbf16>,
      %cst_211 = arith.constant dense<0.000000e+00> : vector<8xf32>
      %283 = vector.multi_reduction <add>, %274, %cst_211 [0] : vector<8x8xf32> to vector<8xf32>
      %284 = vector.shape_cast %283 : vector<8xf32> to vector<1x8xf32>
      %285 = arith.truncf %284 : vector<1x8xf32> to vector<1x8xbf16>
      %c2_212 = arith.constant 2 : index
      %c0_213 = arith.constant 0 : index
      %c0_214 = arith.constant 0 : index
      %286 = vector.load %arg9[%c2_212, %c0_213, %c0_214] : memref<4x8x32xbf16, #tpu.memory_space<vmem>>, vector<1x8x32xbf16>
      %287 = vector.shape_cast %286 : vector<1x8x32xbf16> to vector<8x32xbf16>
      %cst_215 = arith.constant dense<0.000000e+00> : vector<1x32xf32>
      %288 = tpu.matmul %285, %287, %cst_215 {dimension_numbers = #tpu.dot_dimension_numbers<[1], [0], [0], [1], [0, 0, 1, 1], [], []>} : vector<1x8xbf16>, vector<8x32xbf16>, vector<1x32xf32> -> vector<1x32xf32>
      %289 = arith.addf %260, %288 : vector<1x32xf32>
      %c3_216 = arith.constant 3 : index
      %c0_217 = arith.constant 0 : index
      %c0_218 = arith.constant 0 : index
      %290 = vector.load %arg5[%c3_216, %c0_217, %c0_218] : memref<4x32x8xbf16, #tpu.memory_space<vmem>>, vector<1x32x8xbf16>
      %291 = vector.shape_cast %290 : vector<1x32x8xbf16> to vector<32x8xbf16>
      %cst_219 = arith.constant dense<0.000000e+00> : vector<8x8xf32>
      %292 = tpu.matmul %201, %291, %cst_219 {dimension_numbers = #tpu.dot_dimension_numbers<[1], [0], [0], [1], [0, 0, 1, 1], [], []>} : vector<8x32xbf16>, vector<32x8xbf16>, vector<8x8xf32> -> vector<8x8xf32>
      %c3_220 = arith.constant 3 : index
      %c0_221 = arith.constant 0 : index
      %c0_222 = arith.constant 0 : index
      %293 = vector.load %arg6[%c3_220, %c0_221, %c0_222] : memref<4x1x8xf32, #tpu.memory_space<vmem>>, vector<1x1x8xf32>
      %294 = vector.shape_cast %293 : vector<1x1x8xf32> to vector<1x8xf32>
      %295 = vector.broadcast %294 : vector<1x8xf32> to vector<8x8xf32>
      %296 = arith.addf %292, %295 : vector<8x8xf32>
      %c3_223 = arith.constant 3 : index
      %c0_224 = arith.constant 0 : index
      %c0_225 = arith.constant 0 : index
      %297 = vector.load %arg7[%c3_223, %c0_224, %c0_225] : memref<4x32x8xbf16, #tpu.memory_space<vmem>>, vector<1x32x8xbf16>
      %298 = vector.shape_cast %297 : vector<1x32x8xbf16> to vector<32x8xbf16>
      %cst_226 = arith.constant dense<0.000000e+00> : vector<8x8xf32>
      %299 = tpu.matmul %201, %298, %cst_226 {dimension_numbers = #tpu.dot_dimension_numbers<[1], [0], [0], [1], [0, 0, 1, 1], [], []>} : vector<8x32xbf16>, vector<32x8xbf16>, vector<8x8xf32> -> vector<8x8xf32>
      %c3_227 = arith.constant 3 : index
      %c0_228 = arith.constant 0 : index
      %c0_229 = arith.constant 0 : index
      %300 = vector.load %arg8[%c3_227, %c0_228, %c0_229] : memref<4x1x8xf32, #tpu.memory_space<vmem>>, vector<1x1x8xf32>
      %301 = vector.shape_cast %300 : vector<1x1x8xf32> to vector<1x8xf32>
      %302 = vector.broadcast %301 : vector<1x8xf32> to vector<8x8xf32>
      %303 = arith.addf %299, %302 : vector<8x8xf32>
      %304 = arith.truncf %296 : vector<8x8xf32> to vector<8x8xbf16>
      %c3_230 = arith.constant 3 : index
      %c0_231 = arith.constant 0 : index
      %c0_232 = arith.constant 0 : index
      %305 = vector.load %arg12[%c3_230, %c0_231, %c0_232] : memref<4x8x8xbf16, #tpu.memory_space<vmem>>, vector<1x8x8xbf16>
      %306 = vector.shape_cast %305 : vector<1x8x8xbf16> to vector<8x8xbf16>
      %307 = vector.shape_cast %304 : vector<8x8xbf16> to vector<1x8x8xbf16>
      tpu.vector_store %arg12[%c3_230, %c0_231, %c0_232], %307 {strides = array<i32>} : memref<4x8x8xbf16, #tpu.memory_space<vmem>>, vector<1x8x8xbf16>,
      %308 = arith.truncf %303 : vector<8x8xf32> to vector<8x8xbf16>
      %c3_233 = arith.constant 3 : index
      %c0_234 = arith.constant 0 : index
      %c0_235 = arith.constant 0 : index
      %309 = vector.load %arg13[%c3_233, %c0_234, %c0_235] : memref<4x8x8xbf16, #tpu.memory_space<vmem>>, vector<1x8x8xbf16>
      %310 = vector.shape_cast %309 : vector<1x8x8xbf16> to vector<8x8xbf16>
      %311 = vector.shape_cast %308 : vector<8x8xbf16> to vector<1x8x8xbf16>
      tpu.vector_store %arg13[%c3_233, %c0_234, %c0_235], %311 {strides = array<i32>} : memref<4x8x8xbf16, #tpu.memory_space<vmem>>, vector<1x8x8xbf16>,
      %cst_236 = arith.constant dense<0.000000e+00> : vector<8xf32>
      %312 = vector.multi_reduction <add>, %303, %cst_236 [0] : vector<8x8xf32> to vector<8xf32>
      %313 = vector.shape_cast %312 : vector<8xf32> to vector<1x8xf32>
      %314 = arith.truncf %313 : vector<1x8xf32> to vector<1x8xbf16>
      %c3_237 = arith.constant 3 : index
      %c0_238 = arith.constant 0 : index
      %c0_239 = arith.constant 0 : index
      %315 = vector.load %arg9[%c3_237, %c0_238, %c0_239] : memref<4x8x32xbf16, #tpu.memory_space<vmem>>, vector<1x8x32xbf16>
      %316 = vector.shape_cast %315 : vector<1x8x32xbf16> to vector<8x32xbf16>
      %cst_240 = arith.constant dense<0.000000e+00> : vector<1x32xf32>
      %317 = tpu.matmul %314, %316, %cst_240 {dimension_numbers = #tpu.dot_dimension_numbers<[1], [0], [0], [1], [0, 0, 1, 1], [], []>} : vector<1x8xbf16>, vector<8x32xbf16>, vector<1x32xf32> -> vector<1x32xf32>
      %318 = arith.addf %289, %317 : vector<1x32xf32>
      %cst_241 = arith.constant 9.999920e-07 : f32
      %319 = vector.broadcast %cst_241 : f32 to vector<1x32xf32>
      %320 = arith.mulf %318, %319 : vector<1x32xf32>
      %c0_242 = arith.constant 0 : index
      %c0_243 = arith.constant 0 : index
      %321 = vector.load %arg14[%c0_242, %c0_243] : memref<1x32xf32, #tpu.memory_space<vmem>>, vector<1x32xf32>
      tpu.vector_store %arg14[%c0_242, %c0_243], %320 {strides = array<i32>} : memref<1x32xf32, #tpu.memory_space<vmem>>, vector<1x32xf32>,
    } else {
    }
    %c8_i32 = arith.constant 8 : i32
    %3 = arith.muli %arg1, %c8_i32 : i32
    %4 = tpu.assume_multiple %3, 8 : i32
    %c0 = arith.constant 0 : index
    %5 = arith.index_cast %4 : i32 to index
    %c0_1 = arith.constant 0 : index
    %6 = vector.load %arg2[%c0, %5, %c0_1] : memref<1x8x32xf32, #tpu.memory_space<vmem>>, vector<1x8x32xf32>
    %7 = vector.shape_cast %6 : vector<1x8x32xf32> to vector<8x32xf32>
    %8 = arith.truncf %7 : vector<8x32xf32> to vector<8x32xbf16>
    %cst = arith.constant 0.000000e+00 : f32
    %9 = vector.broadcast %cst : f32 to vector<8x32xf32>
    %c0_2 = arith.constant 0 : index
    %c0_3 = arith.constant 0 : index
    %c0_4 = arith.constant 0 : index
    %10 = vector.load %arg11[%c0_2, %c0_3, %c0_4] : memref<1x8x32xf32, #tpu.memory_space<vmem>>, vector<1x8x32xf32>
    %11 = vector.shape_cast %10 : vector<1x8x32xf32> to vector<8x32xf32>
    %12 = vector.shape_cast %9 : vector<8x32xf32> to vector<1x8x32xf32>
    tpu.vector_store %arg11[%c0_2, %c0_3, %c0_4], %12 {strides = array<i32>} : memref<1x8x32xf32, #tpu.memory_space<vmem>>, vector<1x8x32xf32>,
    %c0_5 = arith.constant 0 : index
    %c0_6 = arith.constant 0 : index
    %c0_7 = arith.constant 0 : index
    %13 = vector.load %arg3[%c0_5, %c0_6, %c0_7] : memref<4x32x8xbf16, #tpu.memory_space<vmem>>, vector<1x32x8xbf16>
    %14 = vector.shape_cast %13 : vector<1x32x8xbf16> to vector<32x8xbf16>
    %cst_8 = arith.constant dense<0.000000e+00> : vector<8x8xf32>
    %15 = tpu.matmul %8, %14, %cst_8 {dimension_numbers = #tpu.dot_dimension_numbers<[1], [0], [0], [1], [0, 0, 1, 1], [], []>} : vector<8x32xbf16>, vector<32x8xbf16>, vector<8x8xf32> -> vector<8x8xf32>
    %c0_9 = arith.constant 0 : index
    %c0_10 = arith.constant 0 : index
    %c0_11 = arith.constant 0 : index
    %16 = vector.load %arg4[%c0_9, %c0_10, %c0_11] : memref<4x1x8xf32, #tpu.memory_space<vmem>>, vector<1x1x8xf32>
    %17 = vector.shape_cast %16 : vector<1x1x8xf32> to vector<1x8xf32>
    %18 = vector.broadcast %17 : vector<1x8xf32> to vector<8x8xf32>
    %19 = arith.addf %15, %18 : vector<8x8xf32>
    %cst_12 = arith.constant 0.353553265 : f32
    %20 = vector.broadcast %cst_12 : f32 to vector<8x8xf32>
    %21 = arith.mulf %19, %20 : vector<8x8xf32>
    %22 = arith.truncf %21 : vector<8x8xf32> to vector<8x8xbf16>
    %c0_13 = arith.constant 0 : index
    %c0_14 = arith.constant 0 : index
    %c0_15 = arith.constant 0 : index
    %23 = vector.load %arg12[%c0_13, %c0_14, %c0_15] : memref<4x8x8xbf16, #tpu.memory_space<vmem>>, vector<1x8x8xbf16>
    %24 = vector.shape_cast %23 : vector<1x8x8xbf16> to vector<8x8xbf16>
    %c0_16 = arith.constant 0 : index
    %c0_17 = arith.constant 0 : index
    %c0_18 = arith.constant 0 : index
    %25 = vector.load %arg13[%c0_16, %c0_17, %c0_18] : memref<4x8x8xbf16, #tpu.memory_space<vmem>>, vector<1x8x8xbf16>
    %26 = vector.shape_cast %25 : vector<1x8x8xbf16> to vector<8x8xbf16>
    %cst_19 = arith.constant dense<0.000000e+00> : vector<8x8xf32>
    %27 = tpu.matmul %22, %24, %cst_19 {dimension_numbers = #tpu.dot_dimension_numbers<[1], [1], [0], [0], [0, 0, 1, 0], [], []>} : vector<8x8xbf16>, vector<8x8xbf16>, vector<8x8xf32> -> vector<8x8xf32>
    %cst_20 = arith.constant -1.000000e+02 : f32
    %cst_21 = arith.constant 1.000000e+02 : f32
    %28 = vector.broadcast %cst_20 : f32 to vector<8x8xf32>
    %29 = arith.maximumf %28, %27 : vector<8x8xf32>
    %30 = vector.broadcast %cst_21 : f32 to vector<8x8xf32>
    %31 = arith.minimumf %30, %29 : vector<8x8xf32>
    %cst_22 = arith.constant dense<0xFF800000> : vector<8xf32>
    %32 = vector.multi_reduction <maximumf>, %31, %cst_22 [1] : vector<8x8xf32> to vector<8xf32>
    %33 = vector.shape_cast %32 : vector<8xf32> to vector<8x1xf32>
    %34 = vector.broadcast %33 : vector<8x1xf32> to vector<8x8xf32>
    %35 = arith.subf %31, %34 : vector<8x8xf32>
    %36 = math.exp %35 : vector<8x8xf32>
    %cst_23 = arith.constant dense<0.000000e+00> : vector<8xf32>
    %37 = vector.multi_reduction <add>, %36, %cst_23 [1] : vector<8x8xf32> to vector<8xf32>
    %38 = vector.shape_cast %37 : vector<8xf32> to vector<8x1xf32>
    %39 = tpu.reciprocal %38 {approx = true} : vector<8x1xf32> -> vector<8x1xf32>
    %cst_24 = arith.constant 9.999920e-01 : f32
    %40 = vector.broadcast %cst_24 : f32 to vector<8x1xf32>
    %41 = arith.mulf %39, %40 : vector<8x1xf32>
    %42 = vector.broadcast %41 : vector<8x1xf32> to vector<8x8xf32>
    %43 = arith.mulf %36, %42 : vector<8x8xf32>
    %44 = arith.truncf %43 : vector<8x8xf32> to vector<8x8xbf16>
    %cst_25 = arith.constant dense<0.000000e+00> : vector<8x8xf32>
    %45 = tpu.matmul %44, %26, %cst_25 {dimension_numbers = #tpu.dot_dimension_numbers<[1], [0], [0], [1], [0, 0, 1, 1], [], []>} : vector<8x8xbf16>, vector<8x8xbf16>, vector<8x8xf32> -> vector<8x8xf32>
    %c0_26 = arith.constant 0 : index
    %c0_27 = arith.constant 0 : index
    %c0_28 = arith.constant 0 : index
    %46 = vector.load %arg11[%c0_26, %c0_27, %c0_28] : memref<1x8x32xf32, #tpu.memory_space<vmem>>, vector<1x8x32xf32>
    %47 = vector.shape_cast %46 : vector<1x8x32xf32> to vector<8x32xf32>
    %48 = arith.truncf %45 : vector<8x8xf32> to vector<8x8xbf16>
    %c0_29 = arith.constant 0 : index
    %c0_30 = arith.constant 0 : index
    %c0_31 = arith.constant 0 : index
    %49 = vector.load %arg9[%c0_29, %c0_30, %c0_31] : memref<4x8x32xbf16, #tpu.memory_space<vmem>>, vector<1x8x32xbf16>
    %50 = vector.shape_cast %49 : vector<1x8x32xbf16> to vector<8x32xbf16>
    %cst_32 = arith.constant dense<0.000000e+00> : vector<8x32xf32>
    %51 = tpu.matmul %48, %50, %cst_32 {dimension_numbers = #tpu.dot_dimension_numbers<[1], [0], [0], [1], [0, 0, 1, 1], [], []>} : vector<8x8xbf16>, vector<8x32xbf16>, vector<8x32xf32> -> vector<8x32xf32>
    %52 = arith.addf %47, %51 : vector<8x32xf32>
    %c0_33 = arith.constant 0 : index
    %c0_34 = arith.constant 0 : index
    %c0_35 = arith.constant 0 : index
    %53 = vector.load %arg11[%c0_33, %c0_34, %c0_35] : memref<1x8x32xf32, #tpu.memory_space<vmem>>, vector<1x8x32xf32>
    %54 = vector.shape_cast %53 : vector<1x8x32xf32> to vector<8x32xf32>
    %55 = vector.shape_cast %52 : vector<8x32xf32> to vector<1x8x32xf32>
    tpu.vector_store %arg11[%c0_33, %c0_34, %c0_35], %55 {strides = array<i32>} : memref<1x8x32xf32, #tpu.memory_space<vmem>>, vector<1x8x32xf32>,
    %c1 = arith.constant 1 : index
    %c0_36 = arith.constant 0 : index
    %c0_37 = arith.constant 0 : index
    %56 = vector.load %arg3[%c1, %c0_36, %c0_37] : memref<4x32x8xbf16, #tpu.memory_space<vmem>>, vector<1x32x8xbf16>
    %57 = vector.shape_cast %56 : vector<1x32x8xbf16> to vector<32x8xbf16>
    %cst_38 = arith.constant dense<0.000000e+00> : vector<8x8xf32>
    %58 = tpu.matmul %8, %57, %cst_38 {dimension_numbers = #tpu.dot_dimension_numbers<[1], [0], [0], [1], [0, 0, 1, 1], [], []>} : vector<8x32xbf16>, vector<32x8xbf16>, vector<8x8xf32> -> vector<8x8xf32>
    %c1_39 = arith.constant 1 : index
    %c0_40 = arith.constant 0 : index
    %c0_41 = arith.constant 0 : index
    %59 = vector.load %arg4[%c1_39, %c0_40, %c0_41] : memref<4x1x8xf32, #tpu.memory_space<vmem>>, vector<1x1x8xf32>
    %60 = vector.shape_cast %59 : vector<1x1x8xf32> to vector<1x8xf32>
    %61 = vector.broadcast %60 : vector<1x8xf32> to vector<8x8xf32>
    %62 = arith.addf %58, %61 : vector<8x8xf32>
    %cst_42 = arith.constant 0.353553265 : f32
    %63 = vector.broadcast %cst_42 : f32 to vector<8x8xf32>
    %64 = arith.mulf %62, %63 : vector<8x8xf32>
    %65 = arith.truncf %64 : vector<8x8xf32> to vector<8x8xbf16>
    %c1_43 = arith.constant 1 : index
    %c0_44 = arith.constant 0 : index
    %c0_45 = arith.constant 0 : index
    %66 = vector.load %arg12[%c1_43, %c0_44, %c0_45] : memref<4x8x8xbf16, #tpu.memory_space<vmem>>, vector<1x8x8xbf16>
    %67 = vector.shape_cast %66 : vector<1x8x8xbf16> to vector<8x8xbf16>
    %c1_46 = arith.constant 1 : index
    %c0_47 = arith.constant 0 : index
    %c0_48 = arith.constant 0 : index
    %68 = vector.load %arg13[%c1_46, %c0_47, %c0_48] : memref<4x8x8xbf16, #tpu.memory_space<vmem>>, vector<1x8x8xbf16>
    %69 = vector.shape_cast %68 : vector<1x8x8xbf16> to vector<8x8xbf16>
    %cst_49 = arith.constant dense<0.000000e+00> : vector<8x8xf32>
    %70 = tpu.matmul %65, %67, %cst_49 {dimension_numbers = #tpu.dot_dimension_numbers<[1], [1], [0], [0], [0, 0, 1, 0], [], []>} : vector<8x8xbf16>, vector<8x8xbf16>, vector<8x8xf32> -> vector<8x8xf32>
    %cst_50 = arith.constant -1.000000e+02 : f32
    %cst_51 = arith.constant 1.000000e+02 : f32
    %71 = vector.broadcast %cst_50 : f32 to vector<8x8xf32>
    %72 = arith.maximumf %71, %70 : vector<8x8xf32>
    %73 = vector.broadcast %cst_51 : f32 to vector<8x8xf32>
    %74 = arith.minimumf %73, %72 : vector<8x8xf32>
    %cst_52 = arith.constant dense<0xFF800000> : vector<8xf32>
    %75 = vector.multi_reduction <maximumf>, %74, %cst_52 [1] : vector<8x8xf32> to vector<8xf32>
    %76 = vector.shape_cast %75 : vector<8xf32> to vector<8x1xf32>
    %77 = vector.broadcast %76 : vector<8x1xf32> to vector<8x8xf32>
    %78 = arith.subf %74, %77 : vector<8x8xf32>
    %79 = math.exp %78 : vector<8x8xf32>
    %cst_53 = arith.constant dense<0.000000e+00> : vector<8xf32>
    %80 = vector.multi_reduction <add>, %79, %cst_53 [1] : vector<8x8xf32> to vector<8xf32>
    %81 = vector.shape_cast %80 : vector<8xf32> to vector<8x1xf32>
    %82 = tpu.reciprocal %81 {approx = true} : vector<8x1xf32> -> vector<8x1xf32>
    %cst_54 = arith.constant 9.999920e-01 : f32
    %83 = vector.broadcast %cst_54 : f32 to vector<8x1xf32>
    %84 = arith.mulf %82, %83 : vector<8x1xf32>
    %85 = vector.broadcast %84 : vector<8x1xf32> to vector<8x8xf32>
    %86 = arith.mulf %79, %85 : vector<8x8xf32>
    %87 = arith.truncf %86 : vector<8x8xf32> to vector<8x8xbf16>
    %cst_55 = arith.constant dense<0.000000e+00> : vector<8x8xf32>
    %88 = tpu.matmul %87, %69, %cst_55 {dimension_numbers = #tpu.dot_dimension_numbers<[1], [0], [0], [1], [0, 0, 1, 1], [], []>} : vector<8x8xbf16>, vector<8x8xbf16>, vector<8x8xf32> -> vector<8x8xf32>
    %c0_56 = arith.constant 0 : index
    %c0_57 = arith.constant 0 : index
    %c0_58 = arith.constant 0 : index
    %89 = vector.load %arg11[%c0_56, %c0_57, %c0_58] : memref<1x8x32xf32, #tpu.memory_space<vmem>>, vector<1x8x32xf32>
    %90 = vector.shape_cast %89 : vector<1x8x32xf32> to vector<8x32xf32>
    %91 = arith.truncf %88 : vector<8x8xf32> to vector<8x8xbf16>
    %c1_59 = arith.constant 1 : index
    %c0_60 = arith.constant 0 : index
    %c0_61 = arith.constant 0 : index
    %92 = vector.load %arg9[%c1_59, %c0_60, %c0_61] : memref<4x8x32xbf16, #tpu.memory_space<vmem>>, vector<1x8x32xbf16>
    %93 = vector.shape_cast %92 : vector<1x8x32xbf16> to vector<8x32xbf16>
    %cst_62 = arith.constant dense<0.000000e+00> : vector<8x32xf32>
    %94 = tpu.matmul %91, %93, %cst_62 {dimension_numbers = #tpu.dot_dimension_numbers<[1], [0], [0], [1], [0, 0, 1, 1], [], []>} : vector<8x8xbf16>, vector<8x32xbf16>, vector<8x32xf32> -> vector<8x32xf32>
    %95 = arith.addf %90, %94 : vector<8x32xf32>
    %c0_63 = arith.constant 0 : index
    %c0_64 = arith.constant 0 : index
    %c0_65 = arith.constant 0 : index
    %96 = vector.load %arg11[%c0_63, %c0_64, %c0_65] : memref<1x8x32xf32, #tpu.memory_space<vmem>>, vector<1x8x32xf32>
    %97 = vector.shape_cast %96 : vector<1x8x32xf32> to vector<8x32xf32>
    %98 = vector.shape_cast %95 : vector<8x32xf32> to vector<1x8x32xf32>
    tpu.vector_store %arg11[%c0_63, %c0_64, %c0_65], %98 {strides = array<i32>} : memref<1x8x32xf32, #tpu.memory_space<vmem>>, vector<1x8x32xf32>,
    %c2 = arith.constant 2 : index
    %c0_66 = arith.constant 0 : index
    %c0_67 = arith.constant 0 : index
    %99 = vector.load %arg3[%c2, %c0_66, %c0_67] : memref<4x32x8xbf16, #tpu.memory_space<vmem>>, vector<1x32x8xbf16>
    %100 = vector.shape_cast %99 : vector<1x32x8xbf16> to vector<32x8xbf16>
    %cst_68 = arith.constant dense<0.000000e+00> : vector<8x8xf32>
    %101 = tpu.matmul %8, %100, %cst_68 {dimension_numbers = #tpu.dot_dimension_numbers<[1], [0], [0], [1], [0, 0, 1, 1], [], []>} : vector<8x32xbf16>, vector<32x8xbf16>, vector<8x8xf32> -> vector<8x8xf32>
    %c2_69 = arith.constant 2 : index
    %c0_70 = arith.constant 0 : index
    %c0_71 = arith.constant 0 : index
    %102 = vector.load %arg4[%c2_69, %c0_70, %c0_71] : memref<4x1x8xf32, #tpu.memory_space<vmem>>, vector<1x1x8xf32>
    %103 = vector.shape_cast %102 : vector<1x1x8xf32> to vector<1x8xf32>
    %104 = vector.broadcast %103 : vector<1x8xf32> to vector<8x8xf32>
    %105 = arith.addf %101, %104 : vector<8x8xf32>
    %cst_72 = arith.constant 0.353553265 : f32
    %106 = vector.broadcast %cst_72 : f32 to vector<8x8xf32>
    %107 = arith.mulf %105, %106 : vector<8x8xf32>
    %108 = arith.truncf %107 : vector<8x8xf32> to vector<8x8xbf16>
    %c2_73 = arith.constant 2 : index
    %c0_74 = arith.constant 0 : index
    %c0_75 = arith.constant 0 : index
    %109 = vector.load %arg12[%c2_73, %c0_74, %c0_75] : memref<4x8x8xbf16, #tpu.memory_space<vmem>>, vector<1x8x8xbf16>
    %110 = vector.shape_cast %109 : vector<1x8x8xbf16> to vector<8x8xbf16>
    %c2_76 = arith.constant 2 : index
    %c0_77 = arith.constant 0 : index
    %c0_78 = arith.constant 0 : index
    %111 = vector.load %arg13[%c2_76, %c0_77, %c0_78] : memref<4x8x8xbf16, #tpu.memory_space<vmem>>, vector<1x8x8xbf16>
    %112 = vector.shape_cast %111 : vector<1x8x8xbf16> to vector<8x8xbf16>
    %cst_79 = arith.constant dense<0.000000e+00> : vector<8x8xf32>
    %113 = tpu.matmul %108, %110, %cst_79 {dimension_numbers = #tpu.dot_dimension_numbers<[1], [1], [0], [0], [0, 0, 1, 0], [], []>} : vector<8x8xbf16>, vector<8x8xbf16>, vector<8x8xf32> -> vector<8x8xf32>
    %cst_80 = arith.constant -1.000000e+02 : f32
    %cst_81 = arith.constant 1.000000e+02 : f32
    %114 = vector.broadcast %cst_80 : f32 to vector<8x8xf32>
    %115 = arith.maximumf %114, %113 : vector<8x8xf32>
    %116 = vector.broadcast %cst_81 : f32 to vector<8x8xf32>
    %117 = arith.minimumf %116, %115 : vector<8x8xf32>
    %cst_82 = arith.constant dense<0xFF800000> : vector<8xf32>
    %118 = vector.multi_reduction <maximumf>, %117, %cst_82 [1] : vector<8x8xf32> to vector<8xf32>
    %119 = vector.shape_cast %118 : vector<8xf32> to vector<8x1xf32>
    %120 = vector.broadcast %119 : vector<8x1xf32> to vector<8x8xf32>
    %121 = arith.subf %117, %120 : vector<8x8xf32>
    %122 = math.exp %121 : vector<8x8xf32>
    %cst_83 = arith.constant dense<0.000000e+00> : vector<8xf32>
    %123 = vector.multi_reduction <add>, %122, %cst_83 [1] : vector<8x8xf32> to vector<8xf32>
    %124 = vector.shape_cast %123 : vector<8xf32> to vector<8x1xf32>
    %125 = tpu.reciprocal %124 {approx = true} : vector<8x1xf32> -> vector<8x1xf32>
    %cst_84 = arith.constant 9.999920e-01 : f32
    %126 = vector.broadcast %cst_84 : f32 to vector<8x1xf32>
    %127 = arith.mulf %125, %126 : vector<8x1xf32>
    %128 = vector.broadcast %127 : vector<8x1xf32> to vector<8x8xf32>
    %129 = arith.mulf %122, %128 : vector<8x8xf32>
    %130 = arith.truncf %129 : vector<8x8xf32> to vector<8x8xbf16>
    %cst_85 = arith.constant dense<0.000000e+00> : vector<8x8xf32>
    %131 = tpu.matmul %130, %112, %cst_85 {dimension_numbers = #tpu.dot_dimension_numbers<[1], [0], [0], [1], [0, 0, 1, 1], [], []>} : vector<8x8xbf16>, vector<8x8xbf16>, vector<8x8xf32> -> vector<8x8xf32>
    %c0_86 = arith.constant 0 : index
    %c0_87 = arith.constant 0 : index
    %c0_88 = arith.constant 0 : index
    %132 = vector.load %arg11[%c0_86, %c0_87, %c0_88] : memref<1x8x32xf32, #tpu.memory_space<vmem>>, vector<1x8x32xf32>
    %133 = vector.shape_cast %132 : vector<1x8x32xf32> to vector<8x32xf32>
    %134 = arith.truncf %131 : vector<8x8xf32> to vector<8x8xbf16>
    %c2_89 = arith.constant 2 : index
    %c0_90 = arith.constant 0 : index
    %c0_91 = arith.constant 0 : index
    %135 = vector.load %arg9[%c2_89, %c0_90, %c0_91] : memref<4x8x32xbf16, #tpu.memory_space<vmem>>, vector<1x8x32xbf16>
    %136 = vector.shape_cast %135 : vector<1x8x32xbf16> to vector<8x32xbf16>
    %cst_92 = arith.constant dense<0.000000e+00> : vector<8x32xf32>
    %137 = tpu.matmul %134, %136, %cst_92 {dimension_numbers = #tpu.dot_dimension_numbers<[1], [0], [0], [1], [0, 0, 1, 1], [], []>} : vector<8x8xbf16>, vector<8x32xbf16>, vector<8x32xf32> -> vector<8x32xf32>
    %138 = arith.addf %133, %137 : vector<8x32xf32>
    %c0_93 = arith.constant 0 : index
    %c0_94 = arith.constant 0 : index
    %c0_95 = arith.constant 0 : index
    %139 = vector.load %arg11[%c0_93, %c0_94, %c0_95] : memref<1x8x32xf32, #tpu.memory_space<vmem>>, vector<1x8x32xf32>
    %140 = vector.shape_cast %139 : vector<1x8x32xf32> to vector<8x32xf32>
    %141 = vector.shape_cast %138 : vector<8x32xf32> to vector<1x8x32xf32>
    tpu.vector_store %arg11[%c0_93, %c0_94, %c0_95], %141 {strides = array<i32>} : memref<1x8x32xf32, #tpu.memory_space<vmem>>, vector<1x8x32xf32>,
    %c3 = arith.constant 3 : index
    %c0_96 = arith.constant 0 : index
    %c0_97 = arith.constant 0 : index
    %142 = vector.load %arg3[%c3, %c0_96, %c0_97] : memref<4x32x8xbf16, #tpu.memory_space<vmem>>, vector<1x32x8xbf16>
    %143 = vector.shape_cast %142 : vector<1x32x8xbf16> to vector<32x8xbf16>
    %cst_98 = arith.constant dense<0.000000e+00> : vector<8x8xf32>
    %144 = tpu.matmul %8, %143, %cst_98 {dimension_numbers = #tpu.dot_dimension_numbers<[1], [0], [0], [1], [0, 0, 1, 1], [], []>} : vector<8x32xbf16>, vector<32x8xbf16>, vector<8x8xf32> -> vector<8x8xf32>
    %c3_99 = arith.constant 3 : index
    %c0_100 = arith.constant 0 : index
    %c0_101 = arith.constant 0 : index
    %145 = vector.load %arg4[%c3_99, %c0_100, %c0_101] : memref<4x1x8xf32, #tpu.memory_space<vmem>>, vector<1x1x8xf32>
    %146 = vector.shape_cast %145 : vector<1x1x8xf32> to vector<1x8xf32>
    %147 = vector.broadcast %146 : vector<1x8xf32> to vector<8x8xf32>
    %148 = arith.addf %144, %147 : vector<8x8xf32>
    %cst_102 = arith.constant 0.353553265 : f32
    %149 = vector.broadcast %cst_102 : f32 to vector<8x8xf32>
    %150 = arith.mulf %148, %149 : vector<8x8xf32>
    %151 = arith.truncf %150 : vector<8x8xf32> to vector<8x8xbf16>
    %c3_103 = arith.constant 3 : index
    %c0_104 = arith.constant 0 : index
    %c0_105 = arith.constant 0 : index
    %152 = vector.load %arg12[%c3_103, %c0_104, %c0_105] : memref<4x8x8xbf16, #tpu.memory_space<vmem>>, vector<1x8x8xbf16>
    %153 = vector.shape_cast %152 : vector<1x8x8xbf16> to vector<8x8xbf16>
    %c3_106 = arith.constant 3 : index
    %c0_107 = arith.constant 0 : index
    %c0_108 = arith.constant 0 : index
    %154 = vector.load %arg13[%c3_106, %c0_107, %c0_108] : memref<4x8x8xbf16, #tpu.memory_space<vmem>>, vector<1x8x8xbf16>
    %155 = vector.shape_cast %154 : vector<1x8x8xbf16> to vector<8x8xbf16>
    %cst_109 = arith.constant dense<0.000000e+00> : vector<8x8xf32>
    %156 = tpu.matmul %151, %153, %cst_109 {dimension_numbers = #tpu.dot_dimension_numbers<[1], [1], [0], [0], [0, 0, 1, 0], [], []>} : vector<8x8xbf16>, vector<8x8xbf16>, vector<8x8xf32> -> vector<8x8xf32>
    %cst_110 = arith.constant -1.000000e+02 : f32
    %cst_111 = arith.constant 1.000000e+02 : f32
    %157 = vector.broadcast %cst_110 : f32 to vector<8x8xf32>
    %158 = arith.maximumf %157, %156 : vector<8x8xf32>
    %159 = vector.broadcast %cst_111 : f32 to vector<8x8xf32>
    %160 = arith.minimumf %159, %158 : vector<8x8xf32>
    %cst_112 = arith.constant dense<0xFF800000> : vector<8xf32>
    %161 = vector.multi_reduction <maximumf>, %160, %cst_112 [1] : vector<8x8xf32> to vector<8xf32>
    %162 = vector.shape_cast %161 : vector<8xf32> to vector<8x1xf32>
    %163 = vector.broadcast %162 : vector<8x1xf32> to vector<8x8xf32>
    %164 = arith.subf %160, %163 : vector<8x8xf32>
    %165 = math.exp %164 : vector<8x8xf32>
    %cst_113 = arith.constant dense<0.000000e+00> : vector<8xf32>
    %166 = vector.multi_reduction <add>, %165, %cst_113 [1] : vector<8x8xf32> to vector<8xf32>
    %167 = vector.shape_cast %166 : vector<8xf32> to vector<8x1xf32>
    %168 = tpu.reciprocal %167 {approx = true} : vector<8x1xf32> -> vector<8x1xf32>
    %cst_114 = arith.constant 9.999920e-01 : f32
    %169 = vector.broadcast %cst_114 : f32 to vector<8x1xf32>
    %170 = arith.mulf %168, %169 : vector<8x1xf32>
    %171 = vector.broadcast %170 : vector<8x1xf32> to vector<8x8xf32>
    %172 = arith.mulf %165, %171 : vector<8x8xf32>
    %173 = arith.truncf %172 : vector<8x8xf32> to vector<8x8xbf16>
    %cst_115 = arith.constant dense<0.000000e+00> : vector<8x8xf32>
    %174 = tpu.matmul %173, %155, %cst_115 {dimension_numbers = #tpu.dot_dimension_numbers<[1], [0], [0], [1], [0, 0, 1, 1], [], []>} : vector<8x8xbf16>, vector<8x8xbf16>, vector<8x8xf32> -> vector<8x8xf32>
    %c0_116 = arith.constant 0 : index
    %c0_117 = arith.constant 0 : index
    %c0_118 = arith.constant 0 : index
    %175 = vector.load %arg11[%c0_116, %c0_117, %c0_118] : memref<1x8x32xf32, #tpu.memory_space<vmem>>, vector<1x8x32xf32>
    %176 = vector.shape_cast %175 : vector<1x8x32xf32> to vector<8x32xf32>
    %177 = arith.truncf %174 : vector<8x8xf32> to vector<8x8xbf16>
    %c3_119 = arith.constant 3 : index
    %c0_120 = arith.constant 0 : index
    %c0_121 = arith.constant 0 : index
    %178 = vector.load %arg9[%c3_119, %c0_120, %c0_121] : memref<4x8x32xbf16, #tpu.memory_space<vmem>>, vector<1x8x32xbf16>
    %179 = vector.shape_cast %178 : vector<1x8x32xbf16> to vector<8x32xbf16>
    %cst_122 = arith.constant dense<0.000000e+00> : vector<8x32xf32>
    %180 = tpu.matmul %177, %179, %cst_122 {dimension_numbers = #tpu.dot_dimension_numbers<[1], [0], [0], [1], [0, 0, 1, 1], [], []>} : vector<8x8xbf16>, vector<8x32xbf16>, vector<8x32xf32> -> vector<8x32xf32>
    %181 = arith.addf %176, %180 : vector<8x32xf32>
    %c0_123 = arith.constant 0 : index
    %c0_124 = arith.constant 0 : index
    %c0_125 = arith.constant 0 : index
    %182 = vector.load %arg11[%c0_123, %c0_124, %c0_125] : memref<1x8x32xf32, #tpu.memory_space<vmem>>, vector<1x8x32xf32>
    %183 = vector.shape_cast %182 : vector<1x8x32xf32> to vector<8x32xf32>
    %184 = vector.shape_cast %181 : vector<8x32xf32> to vector<1x8x32xf32>
    tpu.vector_store %arg11[%c0_123, %c0_124, %c0_125], %184 {strides = array<i32>} : memref<1x8x32xf32, #tpu.memory_space<vmem>>, vector<1x8x32xf32>,
    %c0_126 = arith.constant 0 : index
    %c0_127 = arith.constant 0 : index
    %c0_128 = arith.constant 0 : index
    %185 = vector.load %arg11[%c0_126, %c0_127, %c0_128] : memref<1x8x32xf32, #tpu.memory_space<vmem>>, vector<1x8x32xf32>
    %186 = vector.shape_cast %185 : vector<1x8x32xf32> to vector<8x32xf32>
    %c0_129 = arith.constant 0 : index
    %c0_130 = arith.constant 0 : index
    %187 = vector.load %arg10[%c0_129, %c0_130] : memref<1x32xf32, #tpu.memory_space<vmem>>, vector<1x32xf32>
    %188 = vector.broadcast %187 : vector<1x32xf32> to vector<8x32xf32>
    %189 = arith.addf %186, %188 : vector<8x32xf32>
    %c0_131 = arith.constant 0 : index
    %c0_132 = arith.constant 0 : index
    %190 = vector.load %arg14[%c0_131, %c0_132] : memref<1x32xf32, #tpu.memory_space<vmem>>, vector<1x32xf32>
    %191 = vector.broadcast %190 : vector<1x32xf32> to vector<8x32xf32>
    %192 = arith.addf %189, %191 : vector<8x32xf32>
    %193 = arith.cmpf one, %192, %192 : vector<8x32xf32>
    %cst_133 = arith.constant 0.000000e+00 : f32
    %194 = vector.broadcast %cst_133 : f32 to vector<8x32xf32>
    %195 = arith.select %193, %194, %192 : vector<8x32xi1>, vector<8x32xf32>
    %c0_134 = arith.constant 0 : index
    %c0_135 = arith.constant 0 : index
    %c0_136 = arith.constant 0 : index
    %196 = vector.load %arg11[%c0_134, %c0_135, %c0_136] : memref<1x8x32xf32, #tpu.memory_space<vmem>>, vector<1x8x32xf32>
    %197 = vector.shape_cast %196 : vector<1x8x32xf32> to vector<8x32xf32>
    %198 = vector.shape_cast %195 : vector<8x32xf32> to vector<1x8x32xf32>
    tpu.vector_store %arg11[%c0_134, %c0_135, %c0_136], %198 {strides = array<i32>} : memref<1x8x32xf32, #tpu.memory_space<vmem>>, vector<1x8x32xf32>,
    return
  }
  func.func @transform_0(%arg0: i32, %arg1: i32) -> (i32, i32, i32) {
    %c0_i32 = arith.constant 0 : i32
    %c0_i32_0 = arith.constant 0 : i32
    %c0_i32_1 = arith.constant 0 : i32
    return %arg0, %c0_i32, %c0_i32_0 : i32, i32, i32
  }
  func.func @transform_1(%arg0: i32, %arg1: i32) -> (i32, i32, i32) {
    %c0_i32 = arith.constant 0 : i32
    %c0_i32_0 = arith.constant 0 : i32
    %c0_i32_1 = arith.constant 0 : i32
    %c0_i32_2 = arith.constant 0 : i32
    return %c0_i32, %c0_i32_0, %c0_i32_1 : i32, i32, i32
  }
  func.func @transform_2(%arg0: i32, %arg1: i32) -> (i32, i32, i32) {
    %c0_i32 = arith.constant 0 : i32
    %c0_i32_0 = arith.constant 0 : i32
    %c0_i32_1 = arith.constant 0 : i32
    %c0_i32_2 = arith.constant 0 : i32
    return %c0_i32, %c0_i32_0, %c0_i32_1 : i32, i32, i32
  }
  func.func @transform_3(%arg0: i32, %arg1: i32) -> (i32, i32, i32) {
    %c0_i32 = arith.constant 0 : i32
    %c0_i32_0 = arith.constant 0 : i32
    %c0_i32_1 = arith.constant 0 : i32
    %c0_i32_2 = arith.constant 0 : i32
    return %c0_i32, %c0_i32_0, %c0_i32_1 : i32, i32, i32
  }
  func.func @transform_4(%arg0: i32, %arg1: i32) -> (i32, i32, i32) {
    %c0_i32 = arith.constant 0 : i32
    %c0_i32_0 = arith.constant 0 : i32
    %c0_i32_1 = arith.constant 0 : i32
    %c0_i32_2 = arith.constant 0 : i32
    return %c0_i32, %c0_i32_0, %c0_i32_1 : i32, i32, i32
  }
  func.func @transform_5(%arg0: i32, %arg1: i32) -> (i32, i32, i32) {
    %c0_i32 = arith.constant 0 : i32
    %c0_i32_0 = arith.constant 0 : i32
    %c0_i32_1 = arith.constant 0 : i32
    %c0_i32_2 = arith.constant 0 : i32
    return %c0_i32, %c0_i32_0, %c0_i32_1 : i32, i32, i32
  }
  func.func @transform_6(%arg0: i32, %arg1: i32) -> (i32, i32, i32) {
    %c0_i32 = arith.constant 0 : i32
    %c0_i32_0 = arith.constant 0 : i32
    %c0_i32_1 = arith.constant 0 : i32
    %c0_i32_2 = arith.constant 0 : i32
    return %c0_i32, %c0_i32_0, %c0_i32_1 : i32, i32, i32
  }
  func.func @transform_7(%arg0: i32, %arg1: i32) -> (i32, i32, i32) {
    %c0_i32 = arith.constant 0 : i32
    %c0_i32_0 = arith.constant 0 : i32
    %c0_i32_1 = arith.constant 0 : i32
    %c0_i32_2 = arith.constant 0 : i32
    return %c0_i32, %c0_i32_0, %c0_i32_1 : i32, i32, i32
  }
  func.func @transform_8(%arg0: i32, %arg1: i32) -> (i32, i32) {
    %c0_i32 = arith.constant 0 : i32
    %c0_i32_0 = arith.constant 0 : i32
    %c0_i32_1 = arith.constant 0 : i32
    return %c0_i32, %c0_i32_0 : i32, i32
  }
  func.func @transform_9(%arg0: i32, %arg1: i32) -> (i32, i32, i32) {
    %c0_i32 = arith.constant 0 : i32
    %c0_i32_0 = arith.constant 0 : i32
    return %arg0, %arg1, %c0_i32 : i32, i32, i32
  }
}

</mosaic_0001>

<bundles_post_ra>
// kernel: tpu_custom_call.1
= control target key start
LH: loop header
LB: loop body
LE: loop exit
PB: predicated region body
PF: predicated region fallthrough
CT: control target
= control target key end

     0   :  { %14 = vsyncpa [#allocation6], 0  ;;  %s3212_s0 = inlined_call_operand.vmem [shape: f32[2,8,32], index: 0, kind: input, shape index: {}]   ;;  %s3213_s1 = inlined_call_operand.vmem [shape: bf16[4,32,8], index: 1, kind: input, shape index: {}]   ;;  %s3214_s2 = inlined_call_operand.vmem [shape: f32[4,1,8], index: 2, kind: input, shape index: {}]   ;;  %s3215_s3 = inlined_call_operand.vmem [shape: bf16[4,32,8], index: 3, kind: input, shape index: {}]   ;;  %s3216_s4 = inlined_call_operand.vmem [shape: f32[4,1,8], index: 4, kind: input, shape index: {}]   ;;  %s3217_s5 = inlined_call_operand.vmem [shape: bf16[4,32,8], index: 5, kind: input, shape index: {}]   ;;  %s3218_s6 = inlined_call_operand.vmem [shape: f32[4,1,8], index: 6, kind: input, shape index: {}]   ;;  %s3219_s7 = inlined_call_operand.vmem [shape: bf16[4,8,32], index: 7, kind: input, shape index: {}]   ;;  %s3220_s8 = inlined_call_operand.vmem [shape: f32[1,32], index: 8, kind: input, shape index: {}]   ;;  %s3221_s9 = inlined_call_operand.hbm [shape: f32[2,8,32], index: 9, kind: output, shape index: {}]  }
   0x1   :  { %16 = vsyncpa [#allocation6 + $0x1], 0  ;;  %s2773_s30 = smov 0   ;;  %s2775_s10 = smov 0  }
   0x2   :  { %s2777_s11 = smov 0   ;;  %s2779_s12 = smov 0  }
   0x3   :  { %s2781_s13 = smov 0   ;;  %s2783_s14 = smov 0  }
   0x4 LB: > { %s2153_s15 = sadd.s32 4294967295, %s2718_s14   ;;  %s2154_s16 = sadd.s32 4294967294, %s2718_s14   ;;  %s2718_s14 = sphi %s2783_s14, %s22_s14   ;;  %s2714_s13 = sphi %s2781_s13, %s3228_s13   ;;  %s2710_s12 = sphi %s2779_s12, %s3227_s12   ;;  %s2706_s11 = sphi %s2777_s11, %s3226_s11   ;;  %s2702_s10 = sphi %s2775_s10, %s3225_s10   ;;  %s2698_s30 = sphi %s2773_s30, %s3224_s30  }
   0x5   : > { %s34_s17 = sadd.s32 1, %s2714_s13  ;;  %s237_s18 = sadd.s32 1, %s2706_s11 }
   0x6   : > { %p36_p0 = scmp.ge.s32.totalorder %s34_s17, 2  ;;  %p247_p1 = scmp.ne.s32.totalorder %s2706_s11, %s2702_s10 }
   0x7   : > { %p248_p2 = scmp.eq.s32.totalorder %s2153_s15, 1  ;;  %p253_p3 = scmp.ne.s32.totalorder %s2702_s10, %s2698_s30 }
   0x8   : > { %s3230_s17 = smov (%p36_p0, %s34_s17), 0  ;;  %p254_p5 = scmp.eq.s32.totalorder %s2154_s16, 1 }
   0x9   : > { %p2813_p4 = por %p248_p2, %p247_p1  ;;  %s232_s20 = ssub.s32 %s2714_s13, %s3230_s17 }
   0xa   : > { %p2157_p6 = scmp.ge.s32.totalorder %s2718_s14, 1  ;;  %p235_p7 = scmp.eq.s32.totalorder %s232_s20, 0 }
   0xb   : > { %p2820_p8 = por %p254_p5, %p253_p3  ;;  %p303_p9 = scmp.lt.s32.totalorder %s2718_s14, 3 }
   0xc   : > { %s2826_s22 = scalar_select %p235_p7, %s2706_s11, %s237_s18  }
   0xd   : > { %p304_p10 = pnand %p2157_p6, %p303_p9 }
   0xe   : > { %p338_p11 = scmp.lt.s32.totalorder (!%p304_p10), %s2710_s12, 1  ;;  %s335_s15 = sand.u32 (!%p304_p10), 1, %s2702_s10  }
   0xf   : > { %307 = sbr.rel (%p304_p10) target bundleno = 3765 (0xeb5), region = 56  ;;  %s2158_s16 = sshll.u32 (!%p304_p10), %s335_s15, 3 }
  0x10   : > { %s3054_s18 = scalar_lea.vmem (!%p304_p10), [#allocation5], %s2158_s16  ;;  %s2282_s26 = sshll.u32 (!%p304_p10), %s2710_s12, 7 }
  0x11   : > { %s3168_s16 = scalar_lea.hbm (!%p304_p10), %s3221_s9, %s2282_s26 }
  0x14   : > { %v2602_v0 = vld [vmem:[%s3217_s5 + $0x8] sm:$0xff]   ;;  %v2720_v1 = vmov 0.0   ;;  %v2603_v2 = vld [vmem:[%s3217_s5] sm:$0xff]   ;;  %vm2721_vm0 = vmmov 0   ;;  %s339_s27 = scalar_select %p338_p11, %s2710_s12, 1  ;;  %v2604_v3 = vld [vmem:[%s3217_s5 + $0x18] sm:$0xff]  }
  0x15   : > { %2361 = vmatprep.subr.bf16.mxu1 %v2720_v1  ;;  %2353 = vmatprep.subr.bf16.mxu0 %v2720_v1  ;;  %vm372_vm1 = vcmask 261120   ;;  %v2605_v6 = vld [vmem:[%s3217_s5 + $0x10] sm:$0xff]   ;;  %v2606_v7 = vld [vmem:[%s3215_s3 + $0x8] sm:$0xff]   ;;  %v2607_v8 = vld [vmem:[%s3215_s3] sm:$0xff]   ;;  %vm643_vm2 = vcmask 1043456   ;;  %vm484_vm3 = vcmask 64512  }
  0x16   : > { %2362 = vmatpush3.bf16.msra.mxu1 %v2602_v0  ;;  %2365 = vmatprep.mubr.msk.bf16.mxu1 %vm2721_vm0, %v2720_v1  ;;  %s2159_s28 = sshll.u32 %s339_s27, 3  ;;  %v2608_v9 = vld [vmem:[%s3215_s3 + $0x18] sm:$0xff]   ;;  %v493_v10 = vld [vmem:[%s3219_s7] sm:$0xf]  ;;  %v2609_v11 = vld [vmem:[%s3215_s3 + $0x10] sm:$0xff]   ;;  %vm480_vm4 = vcmask 60416  }
  0x17   : > { %2363 = vmatprep.subr.bf16.mxu1 %v2720_v1  ;;  %2357 = vmatprep.mubr.msk.bf16.mxu0 %vm2721_vm0, %v2720_v1  ;;  %s341_s20 = scalar_lea.vmem %s3212_s0, %s2159_s28  ;;  %v691_v12 = vsel %vm643_vm2, %v493_v10, 0  ;;  %v2186_v13 = vld [vmem:[%s3219_s7 + $0x4] sm:$0xf]  ;;  %v2164_v15 = vld [vmem:[%s3218_s6] ss:$0 sm:$0xff]  ;;  %v2610_v39 = vld [vmem:[%s3217_s5 + $0x28] sm:$0xff]  }
  0x18   : > { %v347_v4 = vld [vmem:[%s341_s20] sm:$0xff]  ;;  %2354 = vmatpush3.bf16.msra.mxu0 %v2606_v7  ;;  %v645_v14 = vsel %vm643_vm2, %v2186_v13, 0  ;;  %v2612_v59 = vld [vmem:[%s3215_s3 + $0x28] sm:$0xff]   ;;  %vm1120_vm5 = vcmask 253952   ;;  %1127 = vst.msk [vmem:[%s3054_s18] sm:$0xff] %vm372_vm1, %v2720_v1  ;;  %s2083_s27 = sshll.u32 %s3054_s18, 4  ;;  %s2084_s27 = int_to_ptr.vmem [resolvable:$true] %s2083_s27 }
  0x19   : > { %v2850_v5 = vpack.c.bf16 %v347_v4, %v347_v4  ;;  %2355 = vmatprep.subr.bf16.mxu0 %v2720_v1  ;;  %v2182_v25 = vld [vmem:[%s3218_s6 + $0x1] ss:$0 sm:$0xff]  ;;  %v2160_v47 = vld [vmem:[%s3216_s4] ss:$0 sm:$0xff]  ;;  %v2207_v63 = vld [vmem:[%s3219_s7 + $0x8] sm:$0xf] }
  0x1a   : > { %2364 = vmatpush3.bf16.msra.mxu1 %v2603_v2  ;;  %v2611_v43 = vld [vmem:[%s3217_s5 + $0x20] sm:$0xff]   ;;  %v883_v0 = vsel %vm643_vm2, %v2207_v63, 0  ;;  %s2069_s20 = scalar_lea.sflag [#allocation6], %s335_s15  ;;  %s2642_s23 = scalar_lea.vmem %s2084_s27, 128 }
  0x1b   : > { %2377 = vmatprep.subr.bf16.mxu1 %v2720_v1  ;;  %v2173_v54 = vld [vmem:[%s3216_s4 + $0x1] ss:$0 sm:$0xff]  ;;  %v2203_v7 = vld [vmem:[%s3218_s6 + $0x2] ss:$0 sm:$0xff]  ;;  %v2229_v63 = vld [vmem:[%s3214_s2] ss:$0 sm:$0xff]  ;;  %p2643_p12 = scmp.ne.s32.totalorder %s2084_s27, %s2642_s23 }
  0x1c   : > { %2356 = vmatpush3.bf16.msra.mxu0 %v2607_v8  ;;  %v2613_v62 = vld [vmem:[%s3215_s3 + $0x20] sm:$0xff]   ;;  %s2722_s12 = smov [#allocation5]  }
  0x1d   : > { %2366 = vmatmul.mubr.msk.bf16.vlgmr.msra.gmra.mxu1 %vm372_vm1, %v2850_v5  ;;  %2369 = vmatprep.subr.bf16.mxu0 %v2720_v1  ;;  %p2644_p13 = pnand %p2643_p12, %p2813_p4  ;;  %s2646_s24 = sshll.u32 %s2722_s12, 4  ;;  %s2647_s24 = int_to_ptr.vmem [resolvable:$false] %s2646_s24 }
  0x1e   : > { %2378 = vmatpush3.bf16.msra.mxu1 %v2604_v3  ;;  %2381 = vmatprep.mubr.msk.bf16.mxu1 %vm2721_vm0, %v2720_v1  ;;  %s2648_s25 = scalar_lea.vmem %s2647_s24, 256  ;;  %p2649_p1 = scmp.lt.s32.totalorder %s2084_s27, %s2647_s24 }
  0x1f   : > { %2379 = vmatprep.subr.bf16.mxu1 %v2720_v1  ;;  %2358 = vmatmul.mubr.msk.bf16.vlgmr.msra.gmra.mxu0 %vm372_vm1, %v2850_v5  ;;  %p2645_p0 = pneg %p2644_p13  ;;  %p2650_p2 = scmp.lt.s32.totalorder %s2648_s25, %s2642_s23 }
  0x20   : > { %2370 = vmatpush3.bf16.msra.mxu0 %v2608_v9  ;;  %2373 = vmatprep.mubr.msk.bf16.mxu0 %vm2721_vm0, %v2720_v1 }
  0x21   : > { %2371 = vmatprep.subr.bf16.mxu0 %v2720_v1  ;;  %p2651_p3 = por %p2650_p2, %p2649_p1 }
  0x22   : > { %2380 = vmatpush3.bf16.msra.mxu1 %v2605_v6 }
  0x23   : > { %2391 = vmatprep.subr.bf16.mxu1 %v2720_v1  ;;  %p2652_p5 = pnand %p2651_p3, %p2645_p0 }
  0x24   : > { %2372 = vmatpush3.bf16.msra.mxu0 %v2609_v11 }
  0x25   : > { %2382 = vmatmul.mubr.msk.bf16.vlgmr.msra.gmra.mxu1 %vm372_vm1, %v2850_v5  ;;  %2385 = vmatprep.subr.bf16.mxu0 %v2720_v1 }
  0x26   : > { %2393 = vmatprep.mubr.msk.bf16.mxu1 %vm2721_vm0, %v2720_v1  ;;  %2392 = vmatpush3.bf16.msra.mxu1 %v691_v12 }
  0x27   : > { %2405 = vmatprep.subr.bf16.mxu1 %v2720_v1  ;;  %2374 = vmatmul.mubr.msk.bf16.vlgmr.msra.gmra.mxu0 %vm372_vm1, %v2850_v5 }
  0x28   : > { %2387 = vmatprep.mubr.msk.bf16.mxu0 %vm2721_vm0, %v2720_v1  ;;  %2386 = vmatpush3.bf16.msra.mxu0 %v645_v14 }
  0x29   : > { %2397 = vmatprep.subr.bf16.mxu0 %v2720_v1 }
  0xdd   : > { %v473_v16 = vpop.f32.mrf.mxu1 }
  0xde   : > { %v474_v17 = vadd.f32 %v2164_v15, %v473_v16 }
  0xdf   : > { %v2367_v18 = vpop.f32.mrf.mxu1  ;;  %v410_v48 = vpop.f32.mrf.mxu0 }
  0xe0   : > { %v482_v19 = vpack.c.bf16 %v474_v17, %v474_v17  ;;  %v485_v20 = vsel %vm484_vm3, %v474_v17, 0.0  ;;  %v411_v49 = vadd.f32 %v2160_v47, %v410_v48 }
  0xe1   : > { %v486_v21 = vrot.slane %v485_v20, 4  ;;  %v476_v22 = vpop.f32.mrf.mxu1  ;;  %v2359_v50 = vpop.f32.mrf.mxu0 }
  0xe2   : > { %483 = vst.msk [vmem:[#allocation3] sm:$0xf] %vm480_vm4, %v482_v19  ;;  %v479_v51 = vpack.c.bf16 %v411_v49, %v411_v49  ;;  %v2223_v49 = vld [vmem:[%s3218_s6 + $0x3] ss:$0 sm:$0xff] }
  0xe3   : > { %v487_v23 = vadd.f32 %v486_v21, %v485_v20  ;;  %v2368_v24 = vpop.f32.mrf.mxu1  ;;  %v413_v52 = vpop.f32.mrf.mxu0 }
  0xe4   : > { %481 = vst.msk [vmem:[#allocation2] sm:$0xf] %vm480_vm4, %v479_v51 }
  0xe5   : > { %v488_v26 = vrot.slane %v487_v23, 2  ;;  %v618_v27 = vpop.f32.mrf.mxu1  ;;  %v2360_v53 = vpop.f32.mrf.mxu0 }
  0xe6   : > { %v619_v28 = vadd.f32 %v2182_v25, %v618_v27 }
  0xe7   : > { %v489_v29 = vadd.f32 %v488_v26, %v487_v23  ;;  %v2383_v30 = vpop.f32.mrf.mxu1  ;;  %v553_v55 = vpop.f32.mrf.mxu0  ;;  %v2614_v26 = vld [vmem:[%s3217_s5 + $0x38] sm:$0xff]  }
  0xe8   : > { %v627_v31 = vpack.c.bf16 %v619_v28, %v619_v28  ;;  %v630_v32 = vsel %vm484_vm3, %v619_v28, 0.0  ;;  %v554_v56 = vadd.f32 %v2173_v54, %v553_v55  ;;  %v2615_v28 = vld [vmem:[%s3217_s5 + $0x30] sm:$0xff]   ;;  %v2617_v30 = vld [vmem:[%s3213_s1] sm:$0xff]  }
  0xe9   : > { %v490_v33 = vrot.slane %v489_v29, 1  ;;  %v631_v34 = vrot.slane %v630_v32, 4  ;;  %v621_v35 = vpop.f32.mrf.mxu1  ;;  %v2375_v57 = vpop.f32.mrf.mxu0 }
  0xea   : > { %629 = vst.msk [vmem:[#allocation3 + $0x4] sm:$0xf] %vm480_vm4, %v627_v31  ;;  %v624_v58 = vpack.c.bf16 %v554_v56, %v554_v56  ;;  %v1197_v31 = vld [vmem:[#allocation3] sm:$0xf] }
  0xeb   : > { %v491_v36 = vadd.f32 %v490_v33, %v489_v29  ;;  %v632_v37 = vadd.f32 %v631_v34, %v630_v32  ;;  %v2384_v38 = vpop.f32.mrf.mxu1  ;;  %v556_v60 = vpop.f32.mrf.mxu0  ;;  %v2616_v29 = vld [vmem:[%s3213_s1 + $0x8] sm:$0xff]   ;;  %v1265_v32 = vsel %vm643_vm2, %v1197_v31, 0  ;;  %v2194_v33 = vld [vmem:[%s3216_s4 + $0x2] ss:$0 sm:$0xff] }
  0xec   : > { %626 = vst.msk [vmem:[#allocation2 + $0x4] sm:$0xf] %vm480_vm4, %v624_v58 }
  0xed   : > { %v492_v40 = vpack.c.bf16 %v491_v36, %v491_v36  ;;  %v633_v41 = vrot.slane %v632_v37, 2  ;;  %v2376_v61 = vpop.f32.mrf.mxu0 }
  0xef   : > { %v634_v42 = vadd.f32 %v633_v41, %v632_v37  ;;  %2394 = vmatmul.mubr.msk.bf16.vlgmr.msra.gmra.mxu1 %vm484_vm3, %v492_v40  ;;  %v2618_v40 = vld [vmem:[%s3215_s3 + $0x38] sm:$0xff]   ;;  %v2619_v41 = vld [vmem:[%s3215_s3 + $0x30] sm:$0xff]  }
  0xf0   : > { %2406 = vmatpush3.bf16.msra.mxu1 %v2610_v39  ;;  %2409 = vmatprep.mubr.msk.bf16.mxu1 %vm2721_vm0, %v2720_v1 }
  0xf1   : > { %v635_v44 = vrot.slane %v634_v42, 1  ;;  %2407 = vmatprep.subr.bf16.mxu1 %v2720_v1 }
  0xf3   : > { %v636_v45 = vadd.f32 %v635_v44, %v634_v42  ;;  %v2227_v42 = vld [vmem:[%s3219_s7 + $0xc] sm:$0xf] }
  0xf4   : > { %2408 = vmatpush3.bf16.msra.mxu1 %v2611_v43  ;;  %v1076_v43 = vsel %vm643_vm2, %v2227_v42, 0  ;;  %v2620_v42 = vld [vmem:[%s3213_s1 + $0x18] sm:$0xff]  }
  0xf5   : > { %v637_v46 = vpack.c.bf16 %v636_v45, %v636_v45  ;;  %2419 = vmatprep.subr.bf16.mxu1 %v2720_v1 }
  0xf7   : > { %2388 = vmatmul.mubr.msk.bf16.vlgmr.msra.gmra.mxu0 %vm484_vm3, %v637_v46  ;;  %2410 = vmatmul.mubr.msk.bf16.vlgmr.msra.gmra.mxu1 %vm372_vm1, %v2850_v5 }
  0xf8   : > { %2401 = vmatprep.mubr.msk.bf16.mxu0 %vm2721_vm0, %v2720_v1  ;;  %2423 = vmatprep.mubr.msk.bf16.mxu1 %vm2721_vm0, %v2720_v1 }
  0xf9   : > { %2398 = vmatpush3.bf16.msra.mxu0 %v2612_v59  ;;  %2420 = vmatpush3.bf16.msra.mxu1 %v2618_v40 }
  0xfa   : > { %2399 = vmatprep.subr.bf16.mxu0 %v2720_v1  ;;  %2421 = vmatprep.subr.bf16.mxu1 %v2720_v1 }
  0xfd   : > { %2400 = vmatpush3.bf16.msra.mxu0 %v2613_v62  ;;  %2422 = vmatpush3.bf16.msra.mxu1 %v2619_v41 }
  0xfe   : > { %2413 = vmatprep.subr.bf16.mxu0 %v2720_v1  ;;  %2435 = vmatprep.subr.bf16.mxu1 %v2720_v1 }
 0x100   : > { %2402 = vmatmul.mubr.msk.bf16.vlgmr.msra.gmra.mxu0 %vm372_vm1, %v2850_v5  ;;  %2424 = vmatmul.mubr.msk.bf16.vlgmr.msra.gmra.mxu1 %vm372_vm1, %v2850_v5 }
 0x101   : > { %2415 = vmatprep.mubr.msk.bf16.mxu0 %vm2721_vm0, %v2720_v1  ;;  %2414 = vmatpush3.bf16.msra.mxu0 %v883_v0 }
 0x102   : > { %2427 = vmatprep.subr.bf16.mxu0 %v2720_v1  ;;  %2437 = vmatprep.mubr.msk.bf16.mxu1 %vm2721_vm0, %v2720_v1 }
 0x103   : > { %2436 = vmatpush3.bf16.msra.mxu1 %v1076_v43 }
 0x104   : > { %2449 = vmatprep.subr.bf16.mxu1 %v2720_v1 }
 0x1af   : > { %v727_v2 = vpop.f32.mrf.mxu1 }
 0x1b1   : > { %v2395_v3 = vpop.f32.mrf.mxu1 }
 0x1b3   : > { %v730_v4 = vpop.f32.mrf.mxu1 }
 0x1b5   : > { %v2396_v6 = vpop.f32.mrf.mxu1 }
 0x1b7   : > { %v681_v8 = vpop.f32.mrf.mxu0  ;;  %v857_v9 = vpop.f32.mrf.mxu1 }
 0x1b8   : > { %v728_v10 = vadd.f32 %v727_v2, %v681_v8  ;;  %v858_v11 = vadd.f32 %v2203_v7, %v857_v9  ;;  %v1196_v7 = vld [vmem:[#allocation2] sm:$0xf] }
 0x1b9   : > { %v2411_v12 = vpop.f32.mrf.mxu1  ;;  %v2389_v13 = vpop.f32.mrf.mxu0 }
 0x1ba   : > { %v866_v14 = vpack.c.bf16 %v858_v11, %v858_v11  ;;  %v869_v15 = vsel %vm484_vm3, %v858_v11, 0.0  ;;  %v2214_v12 = vld [vmem:[%s3216_s4 + $0x3] ss:$0 sm:$0xff] }
 0x1bb   : > { %v870_v16 = vrot.slane %v869_v15, 4  ;;  %v860_v17 = vpop.f32.mrf.mxu1  ;;  %v684_v18 = vpop.f32.mrf.mxu0 }
 0x1bc   : > { %868 = vst.msk [vmem:[#allocation3 + $0x8] sm:$0xf] %vm480_vm4, %v866_v14 }
 0x1bd   : > { %v871_v19 = vadd.f32 %v870_v16, %v869_v15  ;;  %v2412_v20 = vpop.f32.mrf.mxu1  ;;  %v2390_v21 = vpop.f32.mrf.mxu0 }
 0x1bf   : > { %v872_v22 = vrot.slane %v871_v19, 2 }
 0x1c0   : > { %v792_v34 = vpop.f32.mrf.mxu0  ;;  %v985_v13 = vpop.f32.mrf.mxu1 }
 0x1c1   : > { %v873_v23 = vadd.f32 %v872_v22, %v871_v19  ;;  %v793_v35 = vadd.f32 %v2194_v33, %v792_v34  ;;  %v986_v14 = vadd.f32 %v2214_v12, %v985_v13 }
 0x1c2   : > { %v2403_v36 = vpop.f32.mrf.mxu0  ;;  %v2425_v15 = vpop.f32.mrf.mxu1 }
 0x1c3   : > { %v874_v24 = vrot.slane %v873_v23, 1  ;;  %v863_v37 = vpack.c.bf16 %v793_v35, %v793_v35  ;;  %v1056_v16 = vpack.c.bf16 %v986_v14, %v986_v14  ;;  %v1309_v36 = vld [vmem:[%s3219_s7] sm:$0xf] }
 0x1c4   : > { %v795_v38 = vpop.f32.mrf.mxu0  ;;  %v988_v17 = vpop.f32.mrf.mxu1 }
 0x1c5   : > { %v875_v25 = vadd.f32 %v874_v24, %v873_v23  ;;  %865 = vst.msk [vmem:[#allocation2 + $0x8] sm:$0xf] %vm480_vm4, %v863_v37  ;;  %1058 = vst.msk [vmem:[#allocation2 + $0xc] sm:$0xf] %vm480_vm4, %v1056_v16  ;;  %v1314_v37 = vsel %vm643_vm2, %v1309_v36, 0 }
 0x1c6   : > { %v2404_v39 = vpop.f32.mrf.mxu0  ;;  %v2426_v18 = vpop.f32.mrf.mxu1  ;;  %v2249_v17 = vld [vmem:[%s3219_s7 + $0x4] sm:$0xf] }
 0x1c7   : > { %v876_v27 = vpack.c.bf16 %v875_v25, %v875_v25  ;;  %v1544_v18 = vsel %vm643_vm2, %v2249_v17, 0 }
 0x1c9   : > { %2416 = vmatmul.mubr.msk.bf16.vlgmr.msra.gmra.mxu0 %vm484_vm3, %v876_v27 }
 0x1ca   : > { %2428 = vmatpush3.bf16.msra.mxu0 %v2614_v26  ;;  %2431 = vmatprep.mubr.msk.bf16.mxu0 %vm2721_vm0, %v2720_v1 }
 0x1cb   : > { %2429 = vmatprep.subr.bf16.mxu0 %v2720_v1 }
 0x1ce   : > { %2430 = vmatpush3.bf16.msra.mxu0 %v2615_v28 }
 0x1cf   : > { %2441 = vmatprep.subr.bf16.mxu0 %v2720_v1 }
 0x1d1   : > { %2432 = vmatmul.mubr.msk.bf16.vlgmr.msra.gmra.mxu0 %vm372_vm1, %v2850_v5 }
 0x1d2   : > { %2442 = vmatpush3.bf16.msra.mxu0 %v2616_v29  ;;  %2445 = vmatprep.mubr.msk.bf16.mxu0 %vm2721_vm0, %v2720_v1 }
 0x1d3   : > { %2443 = vmatprep.subr.bf16.mxu0 %v2720_v1 }
 0x1d6   : > { %2444 = vmatpush3.bf16.msra.mxu0 %v2617_v30 }
 0x1d7   : > { %2455 = vmatprep.subr.bf16.mxu0 %v2720_v1 }
 0x1d9   : > { %2446 = vmatmul.mubr.msk.bf16.vlgmr.msra.gmra.mxu0 %vm372_vm1, %v2850_v5 }
 0x1da   : > { %2456 = vmatpush3.bf16.msra.mxu0 %v1265_v32  ;;  %2457 = vmatprep.mubr.msk.bf16.mxu0 %vm2721_vm0, %v2720_v1 }
 0x1db   : > { %2467 = vmatprep.subr.bf16.mxu0 %v2720_v1 }
 0x289   : > { %v919_v44 = vpop.f32.mrf.mxu0 }
 0x28a   : > { %v925_v45 = vadd.f32 %v919_v44, %v728_v10  ;;  %v1203_v10 = vsel %vm484_vm3, %v1196_v7, 0  ;;  %v2621_v44 = vld [vmem:[%s3213_s1 + $0x10] sm:$0xff]  }
 0x28b   : > { %v2417_v46 = vpop.f32.mrf.mxu0 }
 0x28d   : > { %v922_v47 = vpop.f32.mrf.mxu0 }
 0x28f   : > { %v2418_v48 = vpop.f32.mrf.mxu0 }
 0x290   : > { %v1426_v48 = vld [vmem:[#allocation2 + $0x4] sm:$0xf] }
 0x291   : > { %v1050_v50 = vpop.f32.mrf.mxu0 }
 0x292   : > { %v1051_v51 = vadd.f32 %v2223_v49, %v1050_v50 }
 0x293   : > { %v2433_v52 = vpop.f32.mrf.mxu0 }
 0x294   : > { %v1059_v53 = vpack.c.bf16 %v1051_v51, %v1051_v51  ;;  %v1062_v54 = vsel %vm484_vm3, %v1051_v51, 0.0  ;;  %v1433_v51 = vsel %vm484_vm3, %v1426_v48, 0 }
 0x295   : > { %v1063_v55 = vrot.slane %v1062_v54, 4  ;;  %v1053_v56 = vpop.f32.mrf.mxu0 }
 0x296   : > { %1061 = vst.msk [vmem:[#allocation3 + $0xc] sm:$0xf] %vm480_vm4, %v1059_v53 }
 0x297   : > { %v1064_v57 = vadd.f32 %v1063_v55, %v1062_v54  ;;  %v2434_v58 = vpop.f32.mrf.mxu0  ;;  %v2242_v54 = vld [vmem:[%s3214_s2 + $0x1] ss:$0 sm:$0xff] }
 0x299   : > { %v1065_v59 = vrot.slane %v1064_v57, 2  ;;  %v1188_v60 = vpop.f32.mrf.mxu0 }
 0x29a   : > { %v1189_v4 = vadd.f32 %v2229_v63, %v1188_v60 }
 0x29b   : > { %v1066_v61 = vadd.f32 %v1065_v59, %v1064_v57  ;;  %v2447_v62 = vpop.f32.mrf.mxu0 }
 0x29c   : > { %v1194_v9 = vmul.f32 0.35355327, %v1189_v4  ;;  %v1307_v62 = vld [vmem:[%s3054_s18] sm:$0xff] }
 0x29d   : > { %v1067_v0 = vrot.slane %v1066_v61, 1  ;;  %v1191_v2 = vpop.f32.mrf.mxu0 }
 0x29e   : > { %v1195_v11 = vpack.c.bf16 %v1194_v9, %v1194_v9 }
 0x29f   : > { %v1068_v3 = vadd.f32 %v1067_v0, %v1066_v61  ;;  %v2448_v6 = vpop.f32.mrf.mxu0 }
 0x2a1   : > { %v1069_v8 = vpack.c.bf16 %v1068_v3, %v1068_v3 }
 0x2a3   : > { %2438 = vmatmul.mubr.msk.bf16.vlgmr.msra.gmra.mxu1 %vm484_vm3, %v1069_v8 }
 0x2a4   : > { %2450 = vmatpush3.bf16.xpose.msra.mxu1 %v1203_v10  ;;  %2451 = vmatprep.mubr.msk.bf16.mxu1 %vm2721_vm0, %v2720_v1 }
 0x2a5   : > { %2461 = vmatprep.subr.bf16.mxu1 %v2720_v1 }
 0x2ab   : > { %2452 = vmatmul.mubr.msk.bf16.vlgmr.msra.gmra.mxu1 %vm484_vm3, %v1195_v11 }
 0x2ac   : > { %2463 = vmatprep.mubr.msk.bf16.mxu1 %vm2721_vm0, %v2720_v1  ;;  %2462 = vmatpush3.bf16.msra.mxu1 %v1314_v37 }
 0x2ad   : > { %2475 = vmatprep.subr.bf16.mxu1 %v2720_v1 }
 0x363   : > { %v1112_v19 = vpop.f32.mrf.mxu1 }
 0x364   : > { %v1118_v20 = vadd.f32 %v1112_v19, %v925_v45  ;;  %v1428_v45 = vld [vmem:[#allocation3 + $0x4] sm:$0xf] }
 0x365   : > { %v2439_v21 = vpop.f32.mrf.mxu1  ;;  %v1494_v46 = vsel %vm643_vm2, %v1428_v45, 0 }
 0x366   : > { %v1119_v22 = vmul.f32 9.99992e-07, %v1118_v20 }
 0x367   : > { %v1115_v23 = vpop.f32.mrf.mxu1 }
 0x368   : > { %1121 = vst.msk [vmem:[#allocation4] sm:$0x1] %vm1120_vm5, %v1119_v22  ;;  %v2622_v23 = vld [vmem:[%s3213_s1 + $0x28] sm:$0xff]  }
 0x369   : > { %v2440_v24 = vpop.f32.mrf.mxu1 }
 0x36b   : > { %v1239_v25 = vpop.f32.mrf.mxu1 }
 0x36c   : > { %v2234_v26 = vclamps-f32 %v1239_v25, 100.0  ;;  %v2623_v25 = vld [vmem:[%s3213_s1 + $0x20] sm:$0xff]  }
 0x36d   : > { %v2453_v27 = vpop.f32.mrf.mxu1 }
 0x36e   : > { %v1247_v28 = vsel %vm484_vm3, %v2234_v26, -inf }
 0x36f   : > { %1248 = vmax.xlane.f32.xlu0 %v1247_v28  ;;  %v1242_v29 = vpop.f32.mrf.mxu1 }
 0x370   : > { %v1656_v29 = vld [vmem:[#allocation2 + $0x8] sm:$0xf] }
 0x371   : > { %v2454_v30 = vpop.f32.mrf.mxu1 }
 0x3f8   : > { %v1249_v31 = vpop.xlane.xlu0 %1248 }
 0x3f9   : > { %v1250_v32 = vsub.f32 %v2234_v26, %v1249_v31  ;;  %v1658_v26 = vld [vmem:[#allocation3 + $0x8] sm:$0xf] }
 0x3fa   : > { %v1724_v27 = vsel %vm643_vm2, %v1658_v26, 0 }
 0x3fb   : > { %v1251_v33 = vmul.f32 1.442695, %v1250_v32  ;;  %v1663_v32 = vsel %vm484_vm3, %v1656_v29, 0 }
 0x3fd   : > { %2626 = vpow2.f32 %v1251_v33 }
 0x40a   : > { %v2627_v34 = vpop.eup %2626 }
 0x40b   : > { %v1253_v35 = vsel %vm484_vm3, %v2627_v34, 0.0 }
 0x40c   : > { %1254 = vadd.xlane.f32.xlu0 %v1253_v35  ;;  %v2256_v35 = vld [vmem:[%s3214_s2 + $0x2] ss:$0 sm:$0xff] }
 0x495   : > { %v1255_v38 = vpop.xlane.xlu0 %1254 }
 0x496   : > { %2628 = vrcp.f32 %v1255_v38 }
 0x4a3   : > { %v2629_v39 = vpop.eup %2628 }
 0x4a4   : > { %v1257_v40 = vmul.f32 0.999992, %v2629_v39 }
 0x4a6   : > { %v1258_v41 = vmul.f32 %v2627_v34, %v1257_v40 }
 0x4a8   : > { %v1259_v43 = vpack.c.bf16 %v1258_v41, %v1258_v41 }
 0x4aa   : > { %2458 = vmatmul.mubr.msk.bf16.vlgmr.msra.gmra.mxu0 %vm484_vm3, %v1259_v43 }
 0x4ab   : > { %2468 = vmatpush3.bf16.msra.mxu0 %v2620_v42  ;;  %2471 = vmatprep.mubr.msk.bf16.mxu0 %vm2721_vm0, %v2720_v1 }
 0x4ac   : > { %2469 = vmatprep.subr.bf16.mxu0 %v2720_v1 }
 0x4af   : > { %2470 = vmatpush3.bf16.msra.mxu0 %v2621_v44 }
 0x4b0   : > { %2481 = vmatprep.subr.bf16.mxu0 %v2720_v1 }
 0x4b2   : > { %2472 = vmatmul.mubr.msk.bf16.vlgmr.msra.gmra.mxu0 %vm372_vm1, %v2850_v5 }
 0x4b3   : > { %2482 = vmatpush3.bf16.msra.mxu0 %v1494_v46  ;;  %2483 = vmatprep.mubr.msk.bf16.mxu0 %vm2721_vm0, %v2720_v1 }
 0x4b4   : > { %2493 = vmatprep.subr.bf16.mxu0 %v2720_v1 }
 0x56a   : > { %v1301_v47 = vpop.f32.mrf.mxu0 }
 0x56b   : > { %v1308_v49 = vpack.c.bf16 %v1301_v47, %v1301_v47 }
 0x56c   : > { %v2459_v50 = vpop.f32.mrf.mxu0 }
 0x56d   : > { %2464 = vmatmul.mubr.msk.bf16.vlgmr.msra.gmra.mxu1 %vm484_vm3, %v1308_v49 }
 0x56e   : > { %2476 = vmatpush3.bf16.xpose.msra.mxu1 %v1433_v51  ;;  %v1304_v52 = vpop.f32.mrf.mxu0  ;;  %2477 = vmatprep.mubr.msk.bf16.mxu1 %vm2721_vm0, %v2720_v1 }
 0x56f   : > { %2487 = vmatprep.subr.bf16.mxu1 %v2720_v1 }
 0x570   : > { %v2460_v53 = vpop.f32.mrf.mxu0 }
 0x572   : > { %v1417_v55 = vpop.f32.mrf.mxu0 }
 0x573   : > { %v1418_v56 = vadd.f32 %v2242_v54, %v1417_v55 }
 0x574   : > { %v2473_v57 = vpop.f32.mrf.mxu0 }
 0x575   : > { %v1423_v58 = vmul.f32 0.35355327, %v1418_v56 }
 0x576   : > { %v1420_v59 = vpop.f32.mrf.mxu0 }
 0x577   : > { %v1424_v60 = vpack.c.bf16 %v1423_v58, %v1423_v58 }
 0x578   : > { %v2474_v61 = vpop.f32.mrf.mxu0 }
 0x579   : > { %2478 = vmatmul.mubr.msk.bf16.vlgmr.msra.gmra.mxu1 %vm484_vm3, %v1424_v60  ;;  %v2263_v60 = vld [vmem:[%s3219_s7 + $0x8] sm:$0xf] }
 0x57a   : > { %2489 = vmatprep.mubr.msk.bf16.mxu1 %vm2721_vm0, %v2720_v1  ;;  %2488 = vmatpush3.bf16.msra.mxu1 %v1544_v18  ;;  %v1774_v61 = vsel %vm643_vm2, %v2263_v60, 0  ;;  %v2280_v60 = vld [vmem:[#allocation4] ss:$0 sm:$0xff] }
 0x57b   : > { %2501 = vmatprep.subr.bf16.mxu1 %v2720_v1 }
 0x62d   : > { %v1350_v63 = vpop.f32.mrf.mxu1 }
 0x62e   : > { %v1356_v0 = vadd.f32 %v1350_v63, %v1307_v62 }
 0x62f   : > { %v2465_v2 = vpop.f32.mrf.mxu1 }
 0x630   : > { %1357 = vst.msk [vmem:[%s3054_s18] sm:$0xff] %vm372_vm1, %v1356_v0 }
 0x631   : > { %v1353_v3 = vpop.f32.mrf.mxu1 }
 0x632   : > { %v2624_v3 = vld [vmem:[%s3213_s1 + $0x38] sm:$0xff]  }
 0x633   : > { %v2466_v4 = vpop.f32.mrf.mxu1 }
 0x637   : > { %v1536_v43 = vld [vmem:[%s3054_s18] sm:$0xff] }
 0x639   : > { %v1469_v6 = vpop.f32.mrf.mxu1 }
 0x63a   : > { %v2247_v7 = vclamps-f32 %v1469_v6, 100.0  ;;  %v2625_v6 = vld [vmem:[%s3213_s1 + $0x30] sm:$0xff]  }
 0x63b   : > { %v2479_v8 = vpop.f32.mrf.mxu1 }
 0x63c   : > { %v1477_v9 = vsel %vm484_vm3, %v2247_v7, -inf }
 0x63d   : > { %1478 = vmax.xlane.f32.xlu1 %v1477_v9  ;;  %v1472_v10 = vpop.f32.mrf.mxu1 }
 0x63e   : > { %v1886_v10 = vld [vmem:[#allocation2 + $0xc] sm:$0xf] }
 0x63f   : > { %v2480_v11 = vpop.f32.mrf.mxu1 }
 0x6c6   : > { %v1479_v12 = vpop.xlane.xlu1 %1478 }
 0x6c7   : > { %v1480_v13 = vsub.f32 %v2247_v7, %v1479_v12  ;;  %v1888_v7 = vld [vmem:[#allocation3 + $0xc] sm:$0xf] }
 0x6c8   : > { %v1954_v8 = vsel %vm643_vm2, %v1888_v7, 0 }
 0x6c9   : > { %v1481_v14 = vmul.f32 1.442695, %v1480_v13  ;;  %v1893_v13 = vsel %vm484_vm3, %v1886_v10, 0 }
 0x6cb   : > { %2630 = vpow2.f32 %v1481_v14 }
 0x6d8   : > { %v2631_v15 = vpop.eup %2630 }
 0x6d9   : > { %v1483_v16 = vsel %vm484_vm3, %v2631_v15, 0.0 }
 0x6da   : > { %1484 = vadd.xlane.f32.xlu1 %v1483_v16 }
 0x763   : > { %v1485_v19 = vpop.xlane.xlu1 %1484 }
 0x764   : > { %2632 = vrcp.f32 %v1485_v19 }
 0x771   : > { %v2633_v20 = vpop.eup %2632 }
 0x772   : > { %v1487_v21 = vmul.f32 0.999992, %v2633_v20 }
 0x774   : > { %v1488_v22 = vmul.f32 %v2631_v15, %v1487_v21  ;;  %v2270_v15 = vld [vmem:[%s3214_s2 + $0x3] ss:$0 sm:$0xff] }
 0x776   : > { %v1489_v24 = vpack.c.bf16 %v1488_v22, %v1488_v22 }
 0x778   : > { %2484 = vmatmul.mubr.msk.bf16.vlgmr.msra.gmra.mxu0 %vm484_vm3, %v1489_v24 }
 0x779   : > { %2494 = vmatpush3.bf16.msra.mxu0 %v2622_v23  ;;  %2497 = vmatprep.mubr.msk.bf16.mxu0 %vm2721_vm0, %v2720_v1 }
 0x77a   : > { %2495 = vmatprep.subr.bf16.mxu0 %v2720_v1 }
 0x77d   : > { %2496 = vmatpush3.bf16.msra.mxu0 %v2623_v25 }
 0x77e   : > { %2507 = vmatprep.subr.bf16.mxu0 %v2720_v1 }
 0x780   : > { %2498 = vmatmul.mubr.msk.bf16.vlgmr.msra.gmra.mxu0 %vm372_vm1, %v2850_v5 }
 0x781   : > { %2508 = vmatpush3.bf16.msra.mxu0 %v1724_v27  ;;  %2509 = vmatprep.mubr.msk.bf16.mxu0 %vm2721_vm0, %v2720_v1 }
 0x782   : > { %2519 = vmatprep.subr.bf16.mxu0 %v2720_v1 }
 0x838   : > { %v1530_v28 = vpop.f32.mrf.mxu0 }
 0x839   : > { %v1537_v30 = vpack.c.bf16 %v1530_v28, %v1530_v28 }
 0x83a   : > { %v2485_v31 = vpop.f32.mrf.mxu0 }
 0x83b   : > { %2490 = vmatmul.mubr.msk.bf16.vlgmr.msra.gmra.mxu1 %vm484_vm3, %v1537_v30 }
 0x83c   : > { %2502 = vmatpush3.bf16.xpose.msra.mxu1 %v1663_v32  ;;  %v1533_v33 = vpop.f32.mrf.mxu0  ;;  %2503 = vmatprep.mubr.msk.bf16.mxu1 %vm2721_vm0, %v2720_v1 }
 0x83d   : > { %2513 = vmatprep.subr.bf16.mxu1 %v2720_v1 }
 0x83e   : > { %v2486_v34 = vpop.f32.mrf.mxu0 }
 0x840   : > { %v1647_v36 = vpop.f32.mrf.mxu0 }
 0x841   : > { %v1648_v37 = vadd.f32 %v2256_v35, %v1647_v36 }
 0x842   : > { %v2499_v38 = vpop.f32.mrf.mxu0 }
 0x843   : > { %v1653_v39 = vmul.f32 0.35355327, %v1648_v37 }
 0x844   : > { %v1650_v40 = vpop.f32.mrf.mxu0 }
 0x845   : > { %v1654_v41 = vpack.c.bf16 %v1653_v39, %v1653_v39  ;;  %v2277_v39 = vld [vmem:[%s3219_s7 + $0xc] sm:$0xf] }
 0x846   : > { %v2500_v42 = vpop.f32.mrf.mxu0  ;;  %v2004_v40 = vsel %vm643_vm2, %v2277_v39, 0 }
 0x847   : > { %2504 = vmatmul.mubr.msk.bf16.vlgmr.msra.gmra.mxu1 %vm484_vm3, %v1654_v41 }
 0x848   : > { %2515 = vmatprep.mubr.msk.bf16.mxu1 %vm2721_vm0, %v2720_v1  ;;  %2514 = vmatpush3.bf16.msra.mxu1 %v1774_v61 }
 0x849   : > { %2527 = vmatprep.subr.bf16.mxu1 %v2720_v1 }
 0x8fb   : > { %v1580_v44 = vpop.f32.mrf.mxu1 }
 0x8fc   : > { %v1586_v45 = vadd.f32 %v1580_v44, %v1536_v43 }
 0x8fd   : > { %v2491_v46 = vpop.f32.mrf.mxu1 }
 0x8fe   : > { %1587 = vst.msk [vmem:[%s3054_s18] sm:$0xff] %vm372_vm1, %v1586_v45 }
 0x8ff   : > { %v1583_v47 = vpop.f32.mrf.mxu1 }
 0x901   : > { %v2492_v48 = vpop.f32.mrf.mxu1 }
 0x905   : > { %v1766_v23 = vld [vmem:[%s3054_s18] sm:$0xff] }
 0x907   : > { %v1699_v49 = vpop.f32.mrf.mxu1 }
 0x908   : > { %v2261_v50 = vclamps-f32 %v1699_v49, 100.0 }
 0x909   : > { %v2505_v51 = vpop.f32.mrf.mxu1 }
 0x90a   : > { %v1707_v52 = vsel %vm484_vm3, %v2261_v50, -inf }
 0x90b   : > { %1708 = vmax.xlane.f32.xlu0 %v1707_v52  ;;  %v1702_v53 = vpop.f32.mrf.mxu1 }
 0x90d   : > { %v2506_v54 = vpop.f32.mrf.mxu1 }
 0x994   : > { %v1709_v55 = vpop.xlane.xlu0 %1708 }
 0x995   : > { %v1710_v56 = vsub.f32 %v2261_v50, %v1709_v55 }
 0x997   : > { %v1711_v57 = vmul.f32 1.442695, %v1710_v56 }
 0x999   : > { %2634 = vpow2.f32 %v1711_v57  ;;  %v2279_v57 = vld [vmem:[%s3220_s8] ss:$0 sm:$0xff] }
 0x9a6   : > { %v2635_v58 = vpop.eup %2634 }
 0x9a7   : > { %v1713_v59 = vsel %vm484_vm3, %v2635_v58, 0.0 }
 0x9a8   : > { %1714 = vadd.xlane.f32.xlu1 %v1713_v59 }
 0xa31   : > { %v1715_v62 = vpop.xlane.xlu1 %1714 }
 0xa32   : > { %2636 = vrcp.f32 %v1715_v62 }
 0xa3f   : > { %v2637_v63 = vpop.eup %2636 }
 0xa40   : > { %v1717_v0 = vmul.f32 0.999992, %v2637_v63 }
 0xa42   : > { %v1718_v2 = vmul.f32 %v2635_v58, %v1717_v0 }
 0xa44   : > { %v1719_v4 = vpack.c.bf16 %v1718_v2, %v1718_v2 }
 0xa46   : > { %2510 = vmatmul.mubr.msk.bf16.vlgmr.msra.gmra.mxu0 %vm484_vm3, %v1719_v4 }
 0xa47   : > { %2520 = vmatpush3.bf16.msra.mxu0 %v2624_v3  ;;  %2523 = vmatprep.mubr.msk.bf16.mxu0 %vm2721_vm0, %v2720_v1 }
 0xa48   : > { %2521 = vmatprep.subr.bf16.mxu0 %v2720_v1 }
 0xa4b   : > { %2522 = vmatpush3.bf16.msra.mxu0 %v2625_v6 }
 0xa4c   : > { %2533 = vmatprep.subr.bf16.mxu0 %v2720_v1 }
 0xa4e   : > { %2524 = vmatmul.mubr.msk.bf16.vlgmr.msra.gmra.mxu0 %vm372_vm1, %v2850_v5 }
 0xa4f   : > { %2534 = vmatpush3.bf16.msra.mxu0 %v1954_v8  ;;  %2535 = vmatprep.mubr.msk.bf16.mxu0 %vm2721_vm0, %v2720_v1 }
 0xb06   : > { %v1760_v9 = vpop.f32.mrf.mxu0 }
 0xb07   : > { %v1767_v11 = vpack.c.bf16 %v1760_v9, %v1760_v9 }
 0xb08   : > { %v2511_v12 = vpop.f32.mrf.mxu0 }
 0xb09   : > { %2516 = vmatmul.mubr.msk.bf16.vlgmr.msra.gmra.mxu1 %vm484_vm3, %v1767_v11 }
 0xb0a   : > { %2528 = vmatpush3.bf16.xpose.msra.mxu1 %v1893_v13  ;;  %v1763_v14 = vpop.f32.mrf.mxu0  ;;  %2529 = vmatprep.mubr.msk.bf16.mxu1 %vm2721_vm0, %v2720_v1 }
 0xb0b   : > { %2539 = vmatprep.subr.bf16.mxu1 %v2720_v1 }
 0xb0c   : > { %v2512_v5 = vpop.f32.mrf.mxu0 }
 0xb0e   : > { %v1877_v16 = vpop.f32.mrf.mxu0 }
 0xb0f   : > { %v1878_v17 = vadd.f32 %v2270_v15, %v1877_v16 }
 0xb10   : > { %v2525_v18 = vpop.f32.mrf.mxu0 }
 0xb11   : > { %v1883_v19 = vmul.f32 0.35355327, %v1878_v17 }
 0xb12   : > { %v1880_v20 = vpop.f32.mrf.mxu0 }
 0xb13   : > { %v1884_v21 = vpack.c.bf16 %v1883_v19, %v1883_v19 }
 0xb14   : > { %v2526_v22 = vpop.f32.mrf.mxu0 }
 0xb15   : > { %2530 = vmatmul.mubr.msk.bf16.vlgmr.msra.gmra.mxu1 %vm484_vm3, %v1884_v21 }
 0xb16   : > { %2541 = vmatprep.mubr.msk.bf16.mxu1 %vm2721_vm0, %v2720_v1  ;;  %2540 = vmatpush3.bf16.msra.mxu1 %v2004_v40 }
 0xbc9   : > { %v1810_v24 = vpop.f32.mrf.mxu1 }
 0xbca   : > { %v1816_v25 = vadd.f32 %v1810_v24, %v1766_v23 }
 0xbcb   : > { %v2517_v26 = vpop.f32.mrf.mxu1 }
 0xbcc   : > { %1817 = vst.msk [vmem:[%s3054_s18] sm:$0xff] %vm372_vm1, %v1816_v25 }
 0xbcd   : > { %v1813_v27 = vpop.f32.mrf.mxu1 }
 0xbcf   : > { %v2518_v28 = vpop.f32.mrf.mxu1 }
 0xbd3   : > { %v1996_v51 = vld [vmem:[%s3054_s18] sm:$0xff] }
 0xbd5   : > { %v1929_v29 = vpop.f32.mrf.mxu1 }
 0xbd6   : > { %v2275_v30 = vclamps-f32 %v1929_v29, 100.0 }
 0xbd7   : > { %v2531_v31 = vpop.f32.mrf.mxu1 }
 0xbd8   : > { %v1937_v32 = vsel %vm484_vm3, %v2275_v30, -inf }
 0xbd9   : > { %1938 = vmax.xlane.f32.xlu0 %v1937_v32  ;;  %v1932_v33 = vpop.f32.mrf.mxu1 }
 0xbdb   : > { %v2532_v34 = vpop.f32.mrf.mxu1 }
 0xc62   : > { %v1939_v35 = vpop.xlane.xlu0 %1938 }
 0xc63   : > { %v1940_v36 = vsub.f32 %v2275_v30, %v1939_v35 }
 0xc65   : > { %v1941_v37 = vmul.f32 1.442695, %v1940_v36 }
 0xc67   : > { %2638 = vpow2.f32 %v1941_v37 }
 0xc74   : > { %v2639_v1 = vpop.eup %2638 }
 0xc75   : > { %v1943_v38 = vsel %vm484_vm3, %v2639_v1, 0.0 }
 0xc76   : > { %1944 = vadd.xlane.f32.xlu1 %v1943_v38 }
 0xcff   : > { %v1945_v41 = vpop.xlane.xlu1 %1944 }
 0xd00   : > { %2640 = vrcp.f32 %v1945_v41 }
 0xd0d   : > { %v2641_v42 = vpop.eup %2640 }
 0xd0e   : > { %v1947_v43 = vmul.f32 0.999992, %v2641_v42 }
 0xd10   : > { %v1948_v44 = vmul.f32 %v2639_v1, %v1947_v43 }
 0xd12   : > { %v1949_v45 = vpack.c.bf16 %v1948_v44, %v1948_v44 }
 0xd14   : > { %2536 = vmatmul.mubr.msk.bf16.vlgmr.msra.gmra.mxu0 %vm484_vm3, %v1949_v45 }
 0xdd4   : > { %v1990_v46 = vpop.f32.mrf.mxu0 }
 0xdd5   : > { %v1997_v47 = vpack.c.bf16 %v1990_v46, %v1990_v46 }
 0xdd6   : > { %v2537_v48 = vpop.f32.mrf.mxu0 }
 0xdd7   : > { %2542 = vmatmul.mubr.msk.bf16.vlgmr.msra.gmra.mxu1 %vm484_vm3, %v1997_v47 }
 0xdd8   : > { %v1993_v49 = vpop.f32.mrf.mxu0 }
 0xdda   : > { %v2538_v50 = vpop.f32.mrf.mxu0 }
 0xe97   : > { %v2040_v52 = vpop.f32.mrf.mxu1 }
 0xe98   : > { %v2046_v53 = vadd.f32 %v2040_v52, %v1996_v51 }
 0xe99   : > { %v2543_v54 = vpop.f32.mrf.mxu1 }
 0xe9a   : > { %2047 = vst.msk [vmem:[%s3054_s18] sm:$0xff] %vm372_vm1, %v2046_v53 }
 0xe9b   : > { %v2043_v55 = vpop.f32.mrf.mxu1 }
 0xe9d   : > { %v2544_v56 = vpop.f32.mrf.mxu1 }
 0xea1   : > { %v2048_v58 = vld [vmem:[%s3054_s18] sm:$0xff] }
 0xea2   : > { %v2056_v59 = vadd.f32 %v2279_v57, %v2048_v58 }
 0xea4   : > { %v2064_v61 = vadd.f32 %v2280_v60, %v2056_v59 }
 0xea6   : > { %vm2065_vm6 = vcmp.ne.f32.partialorder %v2064_v61, %v2064_v61 }
 0xea7   : > { %v2066_v62 = vsel %vm2065_vm6, 0.0, %v2064_v61 }
 0xea8   : > { %2067 = vst.msk [vmem:[%s3054_s18] sm:$0xff] %vm372_vm1, %v2066_v62 }
 0xea9   : > { %2655 = shalt.err (!%p2652_p5)
}
 0xeaa   : > { %s2656_s18 = scalar_lea.hbm %s3168_s16, 128  ;;  %s2660_s28 = scalar_lea.hbm %s3221_s9, 256 }
 0xeab   : > { %p2657_p6 = scmp.ne.s32.totalorder %s3168_s16, %s2656_s18  ;;  %p2661_p10 = scmp.lt.s32.totalorder %s3168_s16, %s3221_s9 }
 0xeac   : > { %p2662_p11 = scmp.lt.s32.totalorder %s2660_s28, %s2656_s18 }
 0xead   : > { %p2658_p7 = pnand %p2657_p6, %p2813_p4 }
 0xeae   : > { %p2663_p12 = por %p2662_p11, %p2661_p10 }
 0xeaf   : > { %p2659_p9 = pneg %p2658_p7 }
 0xeb1   : > { %p2664_p13 = pnand %p2663_p12, %p2659_p9 }
 0xeb3   : > { %2667 = shalt.err (!%p2664_p13)
}
 0xeb4   : > { %2545 = dma.vmem_to_hbm [thread:$0]  (%p2813_p4), %s2084_s27, 128, %s3168_s16, %s2069_s20  }
 0xeb5 PF: > { %p2551_p0 = scmp.ge.s32.totalorder %s2718_s14, 2  ;;  %s2095_s23 = sand.u32 1, %s2698_s30  }
 0xeb6   : > { %s2096_s24 = scalar_lea.sflag [#allocation6], %s2095_s23 }
 0xeb7   : > { %p2548_p1 = pnand %p2551_p0, %p2820_p8 }
 0xeb9   : > { %p2549_p2 = pneg %p2548_p1 }
 0xebb   : > { %2693 = dma.done.wait (%p2549_p2), %s2096_s24, 128  }
 0xebc   : > { %2695 = vsyncadd (%p2549_p2), %s2096_s24, 4294967168  ;;  %s22_s14 = sadd.s32 1, %s2718_s14   ;;  %s3224_s30 = smov %s2702_s10 }
 0xebd   : > { %p19_p3 = scmp.ge.s32.totalorder %s22_s14, 4   ;;  %s3225_s10 = smov %s2706_s11 }
 0xebe   : > { %s3226_s11 = smov %s2826_s22  ;;  %s3227_s12 = smov %s2714_s13 }
 0xebf   : > { %s3228_s13 = smov %s3230_s17  ;;  %21 = sbr.rel (!%p19_p3) target bundleno = 4 (0x4), region = 132 }
 0xec4   :  { %2101 = vsyncpa [#allocation6], 1 }
 0xec5   :  { %2103 = vsyncpa [#allocation6 + $0x1], 1 }

</bundles_post_ra>
